<compile_context>
chip_gen: v7x
topology: tpu7x:2x2x1
jax: 0.10.0
libtpu: 0.0.40
codegen_flags: <defaults>
</compile_context>

<pallas_src>
import math

import jax
import jax.numpy as jnp
from jax.experimental import pallas as pl
from jax.experimental.pallas import tpu as pltpu


def _gelu_tanh(x):
    # PyTorch nn.GELU(approximate='tanh'):
    # 0.5 * x * (1 + tanh(sqrt(2/pi) * (x + 0.044715 * x^3)))
    c = math.sqrt(2.0 / math.pi)
    return 0.5 * x * (1.0 + jnp.tanh(c * (x + 0.044715 * x * x * x)))


def mlp_kernel(x_ref, w_fc_ref, b_fc_ref, w_proj_ref, b_proj_ref, o_ref, acc_ref):
    """Grid = (row_tiles, h_chunks). axis 1 is the H reduction (arbitrary)."""
    j = pl.program_id(1)

    @pl.when(j == 0)
    def _():
        acc_ref[...] = jnp.zeros_like(acc_ref)

    # GEMM1 chunk: (TM, E) @ (E, Hc). Operands stay in their native dtype
    # (bf16 stays bf16 -> full-rate MXU); accumulate in f32.
    h = jnp.dot(x_ref[...], w_fc_ref[...], preferred_element_type=jnp.float32)
    h = h + b_fc_ref[...].astype(jnp.float32)

    # GELU (tanh approx) in f32 — VPU/EUP work that overlaps MXU pushes of the
    # neighbouring chunks now that the slab is only (TM, Hc).
    h = _gelu_tanh(h)

    # GEMM2 partial: (TM, Hc) @ (Hc, E), accumulated into the f32 scratch.
    acc_ref[...] += jnp.dot(h.astype(w_proj_ref.dtype), w_proj_ref[...],
                            preferred_element_type=jnp.float32)

    @pl.when(j == pl.num_programs(1) - 1)
    def _():
        y = acc_ref[...] + b_proj_ref[...].astype(jnp.float32)
        o_ref[...] = y.astype(o_ref.dtype)


def _pick_h_chunk(H, target=1024):
    """Largest multiple-of-128 divisor of H that is <= target (else H itself)."""
    best = H
    c = 128
    while c <= min(H, target):
        if H % c == 0:
            best = c
        c += 128
    return best


def _vmem_limit_bytes(need_bytes):
    """Raise the scoped VMEM limit above the real need; never cap below it."""
    try:
        phys = pltpu.get_tpu_info().vmem_capacity_bytes
    except Exception:
        phys = 64 * 1024 * 1024  # conservative (v7x per-TC physical)
    limit = max(int(need_bytes * 3 // 2), 32 * 1024 * 1024)
    limit = min(limit, phys)
    return max(limit, int(need_bytes))  # do not silently under-provision


def mlp_forward(x, w_fc, b_fc, w_proj, b_proj, *, tm=256, h_chunk=None):
    """x: (B, T, E). w_fc: (E, 4E), b_fc: (4E,), w_proj: (4E, E), b_proj: (E,)."""
    B, T, E = x.shape
    H = w_fc.shape[1]
    N = B * T

    x2 = x.reshape(N, E)
    b_fc2 = b_fc.reshape(1, H)
    b_proj2 = b_proj.reshape(1, E)

    # Row tile: multiple of 128 (v5e MXU width); 256+ also feeds v6e/v7x's
    # 2x256 MXU. Shrink for tiny token counts to avoid useless padded rows.
    tm = max(128, (tm // 128) * 128)
    tm = min(tm, max(128, pl.next_power_of_2(max(N, 1))))
    n_row = pl.cdiv(N, tm)
    n_pad = n_row * tm
    if n_pad != N:
        x2 = jnp.pad(x2, ((0, n_pad - N), (0, 0)))

    # Hidden-dim chunking. Single chunk -> weights fully resident (Buffered(1));
    # multiple chunks -> weights streamed per chunk (double-buffered DMA).
    hc = h_chunk if h_chunk is not None else _pick_h_chunk(H)
    assert H % hc == 0, "h_chunk must divide the hidden dim"
    n_h = H // hc
    resident = (n_h == 1)

    def _wspec(shape, index_map):
        if resident:
            return pl.BlockSpec(shape, index_map, pipeline_mode=pl.Buffered(1))
        return pl.BlockSpec(shape, index_map)

    in_specs = [
        pl.BlockSpec((tm, E), lambda i, j: (i, 0)),     # x row tile (pipelined)
        _wspec((E, hc), lambda i, j: (0, j)),           # w_fc chunk
        _wspec((1, hc), lambda i, j: (0, j)),           # b_fc chunk
        _wspec((hc, E), lambda i, j: (j, 0)),           # w_proj chunk
        pl.BlockSpec((1, E), lambda i, j: (0, 0),
                     pipeline_mode=pl.Buffered(1)),     # b_proj (resident)
    ]
    out_spec = pl.BlockSpec((tm, E), lambda i, j: (i, 0))

    in_item = jnp.dtype(x.dtype).itemsize
    w_item = jnp.dtype(w_fc.dtype).itemsize
    wb = 1 if resident else 2  # buffer count for weight-chunk operands
    vmem_need = (
        2 * tm * E * in_item                       # x tiles (double-buffered)
        + 2 * tm * E * in_item                     # y tiles (double-buffered)
        + wb * (E * hc + hc * E) * w_item          # w_fc / w_proj chunk buffers
        + wb * hc * w_item                         # b_fc chunk buffers
        + 1 * E * w_item                           # b_proj (single-buffered)
        + tm * E * 4                               # f32 accumulator scratch
        + tm * hc * 4                              # f32 GELU intermediate
    )

    w_bytes_total = (E * H + H * E + H + E) * w_item
    weight_reads = 1 if resident else n_row        # re-streamed once per row tile
    cost = pl.CostEstimate(
        flops=2 * 2 * n_pad * E * H,               # two GEMMs
        transcendentals=n_pad * H,                 # tanh per hidden element
        bytes_accessed=(2 * n_pad * E * in_item + w_bytes_total * weight_reads),
    )

    out2 = pl.pallas_call(
        mlp_kernel,
        out_shape=jax.ShapeDtypeStruct((n_pad, E), x.dtype),
        grid_spec=pltpu.PrefetchScalarGridSpec(
            num_scalar_prefetch=0,
            grid=(n_row, n_h),
            in_specs=in_specs,
            out_specs=out_spec,
            scratch_shapes=[pltpu.VMEM((tm, E), jnp.float32)],
        ),
        compiler_params=pltpu.CompilerParams(
            # Row tiles shard across v7x's 2 TCs; H axis is the reduction.
            dimension_semantics=("parallel", "arbitrary"),
            vmem_limit_bytes=_vmem_limit_bytes(vmem_need),
        ),
        cost_estimate=cost,
    )(x2, w_fc, b_fc2, w_proj, b_proj2)

    # TODO(synk): for decode-like small N on v7x, shard H across the 2 TCs
    # (each TC owns half the w_fc columns / w_proj rows + partial-sum) instead
    # of row-parallel, to halve per-TC weight residency and weight DMA.
    return out2[:N].reshape(B, T, E)


def reference_mlp(x, w_fc, b_fc, w_proj, b_proj):
    hp = jax.lax.Precision.HIGHEST
    h = jnp.einsum("bte,eh->bth", x, w_fc, precision=hp) + b_fc
    h = _gelu_tanh(h)
    return jnp.einsum("bth,he->bte", h, w_proj, precision=hp) + b_proj


if __name__ == "__main__":
    # Small but lane-dense GPT-2-like config: n_embd=128, seq=256, batch=2
    # -> N=512 tokens -> 2 row tiles of 256.
    B, T, E = 2, 256, 128
    H = 4 * E

    key = jax.random.PRNGKey(0)
    k1, k2, k3, k4, k5 = jax.random.split(key, 5)

    x = jax.random.normal(k1, (B, T, E), dtype=jnp.float32)
    # GPT-2-style init (normal(0, 0.02)); weights stored as (in, out).
    w_fc = 0.02 * jax.random.normal(k2, (E, H), dtype=jnp.float32)
    b_fc = 0.02 * jax.random.normal(k3, (H,), dtype=jnp.float32)
    w_proj = 0.02 * jax.random.normal(k4, (H, E), dtype=jnp.float32)
    b_proj = 0.02 * jax.random.normal(k5, (E,), dtype=jnp.float32)

    ref = reference_mlp(x, w_fc, b_fc, w_proj, b_proj)

    # (1) Recommended path: bf16 operands on the MXU (f32 accumulation).
    #     h_chunk=256 exercises the H-chunked / streamed-weight accumulation.
    bf16 = jnp.bfloat16
    out_bf16 = mlp_forward(x.astype(bf16), w_fc.astype(bf16), b_fc.astype(bf16),
                           w_proj.astype(bf16), b_proj.astype(bf16), h_chunk=256)
    jax.block_until_ready(out_bf16)
    assert out_bf16.shape == (B, T, E) and out_bf16.dtype == bf16
    err_bf16 = float(jnp.max(jnp.abs(out_bf16.astype(jnp.float32) - ref)))
    assert err_bf16 < 2e-2, f"bf16 max abs diff = {err_bf16}"

    # (2) f32 path, single H chunk -> fully-resident Buffered(1) weights.
    out_f32 = mlp_forward(x, w_fc, b_fc, w_proj, b_proj)
    jax.block_until_ready(out_f32)
    err_f32 = float(jnp.max(jnp.abs(out_f32 - ref)))
    assert err_f32 < 1e-2, f"f32 max abs diff = {err_f32}"

    print("KERNEL_OK")
</pallas_src>

<mosaic_0001>
module attributes {stable_mosaic.version = 11 : i64} {
  func.func @mlp_kernel(%arg0: i32, %arg1: i32, %arg2: memref<256x128xbf16, #tpu.memory_space<vmem>>, %arg3: memref<128x256xbf16, #tpu.memory_space<vmem>>, %arg4: memref<1x256xbf16, #tpu.memory_space<vmem>>, %arg5: memref<256x128xbf16, #tpu.memory_space<vmem>>, %arg6: memref<1x128xbf16, #tpu.memory_space<vmem>>, %arg7: memref<256x128xbf16, #tpu.memory_space<vmem>>, %arg8: memref<256x128xf32, #tpu.memory_space<vmem>>) attributes {dimension_semantics = [#tpu.dimension_semantics<parallel>, #tpu.dimension_semantics<arbitrary>], iteration_bounds = array<i64: 2, 2>, scalar_prefetch = 0 : i64, scratch_operands = 1 : i64, tpu.core_type = #tpu.core_type<tc>, window_params = [{transform_indices = @transform_0, window_bounds = array<i64: 256, 128>}, {transform_indices = @transform_1, window_bounds = array<i64: 128, 256>}, {transform_indices = @transform_2, window_bounds = array<i64: 1, 256>}, {transform_indices = @transform_3, window_bounds = array<i64: 256, 128>}, {pipeline_mode = #tpu.pipeline_mode<synchronous>, transform_indices = @transform_4, window_bounds = array<i64: 1, 128>}, {transform_indices = @transform_5, window_bounds = array<i64: 256, 128>}]} {
    %c0_i32 = arith.constant 0 : i32
    %0 = arith.cmpi eq, %arg1, %c0_i32 : i32
    %1 = arith.extui %0 : i1 to i32
    %c0_i32_0 = arith.constant 0 : i32
    %2 = arith.cmpi ne, %1, %c0_i32_0 : i32
    scf.if %2 {
      %cst_18 = arith.constant 0.000000e+00 : f32
      %32 = vector.broadcast %cst_18 : f32 to vector<256x128xf32>
      %c0_19 = arith.constant 0 : index
      %c0_20 = arith.constant 0 : index
      %33 = vector.load %arg8[%c0_19, %c0_20] : memref<256x128xf32, #tpu.memory_space<vmem>>, vector<256x128xf32>
      tpu.vector_store %arg8[%c0_19, %c0_20], %32 {strides = array<i32>} : memref<256x128xf32, #tpu.memory_space<vmem>>, vector<256x128xf32>,
    } else {
    }
    %c0 = arith.constant 0 : index
    %c0_1 = arith.constant 0 : index
    %3 = vector.load %arg2[%c0, %c0_1] : memref<256x128xbf16, #tpu.memory_space<vmem>>, vector<256x128xbf16>
    %c0_2 = arith.constant 0 : index
    %c0_3 = arith.constant 0 : index
    %4 = vector.load %arg3[%c0_2, %c0_3] : memref<128x256xbf16, #tpu.memory_space<vmem>>, vector<128x256xbf16>
    %cst = arith.constant dense<0.000000e+00> : vector<256x256xf32>
    %5 = tpu.matmul %3, %4, %cst {dimension_numbers = #tpu.dot_dimension_numbers<[1], [0], [0], [1], [0, 0, 1, 1], [], []>} : vector<256x128xbf16>, vector<128x256xbf16>, vector<256x256xf32> -> vector<256x256xf32>
    %c0_4 = arith.constant 0 : index
    %c0_5 = arith.constant 0 : index
    %6 = vector.load %arg4[%c0_4, %c0_5] : memref<1x256xbf16, #tpu.memory_space<vmem>>, vector<1x256xbf16>
    %7 = arith.extf %6 : vector<1x256xbf16> to vector<1x256xf32>
    %8 = vector.broadcast %7 : vector<1x256xf32> to vector<256x256xf32>
    %9 = arith.addf %5, %8 : vector<256x256xf32>
    %cst_6 = arith.constant 5.000000e-01 : f32
    %10 = vector.broadcast %cst_6 : f32 to vector<256x256xf32>
    %11 = arith.mulf %10, %9 : vector<256x256xf32>
    %cst_7 = arith.constant 4.471500e-02 : f32
    %12 = vector.broadcast %cst_7 : f32 to vector<256x256xf32>
    %13 = arith.mulf %12, %9 : vector<256x256xf32>
    %14 = arith.mulf %13, %9 : vector<256x256xf32>
    %15 = arith.mulf %14, %9 : vector<256x256xf32>
    %16 = arith.addf %9, %15 : vector<256x256xf32>
    %cst_8 = arith.constant 0.797884583 : f32
    %17 = vector.broadcast %cst_8 : f32 to vector<256x256xf32>
    %18 = arith.mulf %17, %16 : vector<256x256xf32>
    %19 = math.tanh %18 : vector<256x256xf32>
    %cst_9 = arith.constant 1.000000e+00 : f32
    %20 = vector.broadcast %cst_9 : f32 to vector<256x256xf32>
    %21 = arith.addf %20, %19 : vector<256x256xf32>
    %22 = arith.mulf %11, %21 : vector<256x256xf32>
    %c0_10 = arith.constant 0 : index
    %c0_11 = arith.constant 0 : index
    %23 = vector.load %arg8[%c0_10, %c0_11] : memref<256x128xf32, #tpu.memory_space<vmem>>, vector<256x128xf32>
    %24 = arith.truncf %22 : vector<256x256xf32> to vector<256x256xbf16>
    %c0_12 = arith.constant 0 : index
    %c0_13 = arith.constant 0 : index
    %25 = vector.load %arg5[%c0_12, %c0_13] : memref<256x128xbf16, #tpu.memory_space<vmem>>, vector<256x128xbf16>
    %cst_14 = arith.constant dense<0.000000e+00> : vector<256x128xf32>
    %26 = tpu.matmul %24, %25, %cst_14 {dimension_numbers = #tpu.dot_dimension_numbers<[1], [0], [0], [1], [0, 0, 1, 1], [], []>} : vector<256x256xbf16>, vector<256x128xbf16>, vector<256x128xf32> -> vector<256x128xf32>
    %27 = arith.addf %23, %26 : vector<256x128xf32>
    %c0_15 = arith.constant 0 : index
    %c0_16 = arith.constant 0 : index
    %28 = vector.load %arg8[%c0_15, %c0_16] : memref<256x128xf32, #tpu.memory_space<vmem>>, vector<256x128xf32>
    tpu.vector_store %arg8[%c0_15, %c0_16], %27 {strides = array<i32>} : memref<256x128xf32, #tpu.memory_space<vmem>>, vector<256x128xf32>,
    %c1_i32 = arith.constant 1 : i32
    %29 = arith.cmpi eq, %arg1, %c1_i32 : i32
    %30 = arith.extui %29 : i1 to i32
    %c0_i32_17 = arith.constant 0 : i32
    %31 = arith.cmpi ne, %30, %c0_i32_17 : i32
    scf.if %31 {
      %c0_18 = arith.constant 0 : index
      %c0_19 = arith.constant 0 : index
      %32 = vector.load %arg8[%c0_18, %c0_19] : memref<256x128xf32, #tpu.memory_space<vmem>>, vector<256x128xf32>
      %c0_20 = arith.constant 0 : index
      %c0_21 = arith.constant 0 : index
      %33 = vector.load %arg6[%c0_20, %c0_21] : memref<1x128xbf16, #tpu.memory_space<vmem>>, vector<1x128xbf16>
      %34 = arith.extf %33 : vector<1x128xbf16> to vector<1x128xf32>
      %35 = vector.broadcast %34 : vector<1x128xf32> to vector<256x128xf32>
      %36 = arith.addf %32, %35 : vector<256x128xf32>
      %37 = arith.truncf %36 : vector<256x128xf32> to vector<256x128xbf16>
      %c0_22 = arith.constant 0 : index
      %c0_23 = arith.constant 0 : index
      %38 = vector.load %arg7[%c0_22, %c0_23] : memref<256x128xbf16, #tpu.memory_space<vmem>>, vector<256x128xbf16>
      tpu.vector_store %arg7[%c0_22, %c0_23], %37 {strides = array<i32>} : memref<256x128xbf16, #tpu.memory_space<vmem>>, vector<256x128xbf16>,
    } else {
    }
    return
  }
  func.func @transform_0(%arg0: i32, %arg1: i32) -> (i32, i32) {
    %c0_i32 = arith.constant 0 : i32
    %c0_i32_0 = arith.constant 0 : i32
    return %arg0, %c0_i32 : i32, i32
  }
  func.func @transform_1(%arg0: i32, %arg1: i32) -> (i32, i32) {
    %c0_i32 = arith.constant 0 : i32
    %c0_i32_0 = arith.constant 0 : i32
    return %c0_i32, %arg1 : i32, i32
  }
  func.func @transform_2(%arg0: i32, %arg1: i32) -> (i32, i32) {
    %c0_i32 = arith.constant 0 : i32
    %c0_i32_0 = arith.constant 0 : i32
    return %c0_i32, %arg1 : i32, i32
  }
  func.func @transform_3(%arg0: i32, %arg1: i32) -> (i32, i32) {
    %c0_i32 = arith.constant 0 : i32
    %c0_i32_0 = arith.constant 0 : i32
    return %arg1, %c0_i32 : i32, i32
  }
  func.func @transform_4(%arg0: i32, %arg1: i32) -> (i32, i32) {
    %c0_i32 = arith.constant 0 : i32
    %c0_i32_0 = arith.constant 0 : i32
    %c0_i32_1 = arith.constant 0 : i32
    return %c0_i32, %c0_i32_0 : i32, i32
  }
  func.func @transform_5(%arg0: i32, %arg1: i32) -> (i32, i32) {
    %c0_i32 = arith.constant 0 : i32
    %c0_i32_0 = arith.constant 0 : i32
    return %arg0, %c0_i32 : i32, i32
  }
}

</mosaic_0001>

<bundles_post_ra>
// kernel: tpu_custom_call.1
= control target key start
LH: loop header
LB: loop body
LE: loop exit
PB: predicated region body
PF: predicated region fallthrough
CT: control target
= control target key end

     0   :  { %s4298_s0 = inlined_call_operand.hbm [shape: bf16[512,128], index: 0, kind: input, shape index: {}]   ;;  %s4299_s1 = inlined_call_operand.hbm [shape: bf16[128,512], index: 1, kind: input, shape index: {}]   ;;  %s4300_s2 = inlined_call_operand.vmem [shape: bf16[1,512], index: 2, kind: input, shape index: {}]   ;;  %s4301_s3 = inlined_call_operand.hbm [shape: bf16[512,128], index: 3, kind: input, shape index: {}]   ;;  %s4302_s4 = inlined_call_operand.vmem [shape: bf16[1,128], index: 4, kind: input, shape index: {}]   ;;  %s4303_s5 = inlined_call_operand.hbm [shape: bf16[512,128], index: 5, kind: output, shape index: {}]  }
   0x1   :  { %4316 = sst [smem:[#allocation21_spill]] %s4299_s1 }
   0x2   :  { %4317 = sst [smem:[#allocation22_spill]] %s4302_s4 }
   0x3   :  { %4318 = sst [smem:[#allocation23_spill]] %s4303_s5 }
   0x4   :  { %10 = vsyncpa [#allocation4], 0 }
   0x5   :  { %12 = vsyncpa [#allocation4 + $0x1], 0 }
   0x6   :  { %13 = vsyncpa [#allocation7], 0 }
   0x7   :  { %15 = vsyncpa [#allocation7 + $0x1], 0 }
   0x8   :  { %16 = vsyncpa [#allocation5], 0 }
   0x9   :  { %18 = vsyncpa [#allocation5 + $0x1], 0  ;;  %s3122_s18 = smov 0   ;;  %s3124_s19 = smov 0  }
   0xa   :  { %s3126_s20 = smov 0   ;;  %s3128_s21 = smov 0  }
   0xb   :  { %s3130_s22 = smov 0   ;;  %s3132_s23 = smov 0  }
   0xc   :  { %s3134_s24 = smov 0   ;;  %s3136_s25 = smov 0  }
   0xd   :  { %s3138_s26 = smov 0   ;;  %s3140_s27 = smov 0  }
   0xe   :  { %s3142_s28 = smov 0  }
   0xf LB: > { %4319 = sst [smem:[#allocation13_spill]] %s3045_s20  ;;  %s33_s29 = sadd.s32 1, %s3069_s26  ;;  %s3077_s28 = sphi %s3142_s28, %s24_s28   ;;  %s3073_s27 = sphi %s3140_s27, %s4357_s27   ;;  %s3069_s26 = sphi %s3138_s26, %s4363_s26   ;;  %s3065_s25 = sphi %s3136_s25, %s4355_s25   ;;  %s3061_s24 = sphi %s3134_s24, %s4362_s24   ;;  %s3057_s23 = sphi %s3132_s23, %s4354_s23   ;;  %s3053_s22 = sphi %s3130_s22, %s4361_s22   ;;  %s3049_s21 = sphi %s3128_s21, %s4360_s21   ;;  %s3045_s20 = sphi %s3126_s20, %s4352_s20   ;;  %s3041_s19 = sphi %s3124_s19, %s4359_s19   ;;  %s3037_s18 = sphi %s3122_s18, %s4358_s18  }
  0x10   : > { %4320 = sst [smem:[#allocation14_spill]] %s3057_s23  ;;  %p4306_p0 = scmp.eq.s32.totalorder %s3077_s28, 0 }
  0x11   : > { %4321 = sst [smem:[#allocation15_spill]] %s3065_s25  ;;  %p3179_p1 = scmp.ge.s32.totalorder %s33_s29, 2 }
  0x12   : > { %4322 = sst [smem:[#allocation16_spill]] %s3073_s27  ;;  %s69_s6 = sadd.s32 1, %s3045_s20 }
  0x13   : > { %p76_p2 = scmp.ne.s32.totalorder %s3045_s20, %s3041_s19  ;;  %s4365_s29 = smov (%p3179_p1, %s33_s29), 0 }
  0x14   : > { %4324 = sst [smem:[#allocation17_spill]] %s4365_s29  ;;  %s66_s7 = ssub.s32 %s3069_s26, %s4365_s29 }
  0x15   : > { %p78_p4 = por %p76_p2, %p4306_p0  ;;  %p4305_p5 = scmp.lt.s32.totalorder %s3077_s28, 4 }
  0x16   : > { %p67_p6 = scmp.eq.s32.totalorder %s66_s7, 0  ;;  %s229_s8 = sand.u32 1, %s3077_s28  }
  0x17   : > { %s231_s9 = sand.u32 1, %s3045_s20   ;;  %s2314_s12 = sshll.u32 %s3069_s26, 7 }
  0x18   : > { %s3200_s10 = scalar_select %p67_p6, %s3045_s20, %s69_s6  }
  0x19   : > { %s3202_s11 = sshll.u32 %s231_s9, 7  ;;  %s4326_s1 = sld [smem:[#allocation21_spill]] }
  0x1a   : > { %4325 = sst [smem:[#allocation18_spill]] %s3200_s10  ;;  %s233_s16 = scalar_lea.vmem [#allocation6], %s3202_s11 }
  0x1b   : > { %s240_s17 = sshll.u32 %s233_s16, 4  ;;  %p3213_p7 = pnand %p4305_p5, %p78_p4  ;;  %s3217_s17 = int_to_ptr.vmem [resolvable:$true] %s240_s17 }
  0x1c   : > { %s3220_s6 = scalar_lea.sflag [#allocation7], %s229_s8 }
  0x1d   : > { %p4307_p10 = pneg %p3213_p7 }
  0x1f   : > { %s3208_s15 = scalar_lea.hbm %s4326_s1, %s2314_s12  ;;  %s2866_s14 = scalar_lea.hbm %s4326_s1, 4096 }
  0x20   : > { %s2861_s9 = scalar_lea.hbm %s3208_s15, 2048  ;;  %p2867_p13 = scmp.lt.u32.totalorder %s3208_s15, %s4326_s1 }
  0x21   : > { %p2862_p9 = scmp.ne.s32.totalorder %s3208_s15, %s2861_s9  ;;  %p2868_p2 = scmp.lt.u32.totalorder %s2866_s14, %s2861_s9 }
  0x22   : > { %p2870_p6 = scmp.lt.u32.totalorder %s2861_s9, %s3208_s15 }
  0x23   : > { %p2864_p11 = pnand %p4307_p10, %p2862_p9  ;;  %p2869_p4 = por %p2868_p2, %p2867_p13 }
  0x25   : > { %p2865_p12 = pneg %p2864_p11  ;;  %p2871_p5 = por %p2870_p6, %p2869_p4 }
  0x27   : > { %p2872_p3 = pnand %p2871_p5, %p2865_p12 }
  0x29   : > { %2875 = shalt.err (!%p2872_p3)
}
  0x2a   : > { %s2876_s8 = scalar_lea.vmem %s3217_s17, 2048  ;;  %s3079_s12 = smov [#allocation6]  }
  0x2b   : > { %p2877_p9 = scmp.ne.s32.totalorder %s3217_s17, %s2876_s8  ;;  %s2881_s13 = sshll.u32 %s3079_s12, 4  ;;  %s2882_s13 = int_to_ptr.vmem [resolvable:$false] %s2881_s13 }
  0x2c   : > { %s2883_s29 = scalar_lea.vmem %s2882_s13, 4096  ;;  %p2884_p8 = scmp.lt.s32.totalorder %s3217_s17, %s2882_s13 }
  0x2d   : > { %p2879_p11 = pnand %p2877_p9, %p4307_p10  ;;  %p2885_p13 = scmp.lt.s32.totalorder %s2883_s29, %s2876_s8 }
  0x2f   : > { %p2880_p0 = pneg %p2879_p11  ;;  %p2886_p2 = por %p2885_p13, %p2884_p8 }
  0x31   : > { %p2887_p4 = pnand %p2886_p2, %p2880_p0 }
  0x33   : > { %2890 = shalt.err (!%p2887_p4)
}
  0x34   : > { %s3080_s9 = smov 256   ;;  %s3081_s14 = smov 128  }
  0x35   : > { %s3082_s16 = smov 8   ;;  %p277_p0 = scmp.lt.s32.totalorder %s3077_s28, 5 }
  0x36   : > { %2570 = dma.hbm_to_vmem [thread:$0]  (!%p3213_p7), %s3208_s15, 2048, %s3217_s17, %s3220_s6, %s3080_s9, %s3081_s14, %s3082_s16  }
  0x37   : > { %p4328_p3 = scmp.ge.s32.totalorder %s3077_s28, 1  ;;  %s3256_s12 = sadd.s32 4294967295, %s3077_s28  }
  0x38   : > { %s2208_s13 = sadd.s32 4294967294, %s3077_s28   ;;  %s36_s29 = sadd.s32 1, %s3073_s27 }
  0x39   : > { %p3251_p5 = pnand %p4328_p3, %p277_p0  ;;  %s43_s1 = sadd.s32 1, %s3057_s23 }
  0x3a   : > { %s4367_s29 = smov (!%p3179_p1, %s36_s29), %s3073_s27  ;;  %p50_p8 = scmp.ne.s32.totalorder %s3057_s23, %s3053_s22 }
  0x3b   : > { %s4329_s8 = scalar_select %p3251_p5, 1, 0 }
  0x3c   : > { %p56_p12 = scmp.ne.s32.totalorder %s3053_s22, %s3049_s21  ;;  %p38_p6 = scmp.ge.s32.totalorder %s4367_s29, 2 }
  0x3d   : > { %p57_p9 = scmp.eq.s32.totalorder %s3256_s12, 0  ;;  %p4330_p11 = scmp.eq.s32.totalorder %s3077_s28, 0 }
  0x3e   : > { %p179_p2 = scmp.eq.s32.totalorder %s3256_s12, 3  ;;  %s4369_s29 = smov (%p38_p6, %s4367_s29), 0 }
  0x3f   : > { %p3271_p13 = por %p4330_p11, %p50_p8  ;;  %4332 = sst [smem:[#allocation19_spill]] %s4369_s29 }
  0x40   : > { %p3281_p1 = por %p57_p9, %p56_p12  ;;  %p4334_p4 = scmp.ne.s32.totalorder %s3041_s19, %s3037_s18 }
  0x41   : > { %s40_s9 = ssub.s32 %s3073_s27, %s4369_s29  ;;  %p3294_p3 = por %p179_p2, %p50_p8 }
  0x42   : > { %s4333_s30 = scalar_select %p3281_p1, 1, 0 }
  0x43   : > { %p3288_p0 = por %p4334_p4, %p57_p9  ;;  %p41_p11 = scmp.eq.s32.totalorder %s40_s9, 0 }
  0x44   : > { %s4336_s14 = scalar_select %p3294_p3, 1, 0 }
  0x45   : > { %s4335_s17 = scalar_select %p3288_p0, 1, 0 }
  0x46   : > { %p185_p10 = scmp.eq.s32.totalorder %s2208_s13, 3  ;;  %s208_s16 = sand.u32 1, %s3057_s23  }
  0x47   : > { %s2313_s10 = sshll.u32 %s3073_s27, 11  ;;  %s2211_s18 = sshll.u32 %s208_s16, 7 }
  0x48   : > { %s3301_s20 = scalar_select %p41_p11, %s3057_s23, %s43_s1  }
  0x49   : > { %p3306_p6 = por %p185_p10, %p56_p12  ;;  %s3313_s29 = scalar_lea.hbm %s4298_s0, %s2313_s10 }
  0x4a   : > { %4337 = sst [smem:[#allocation20_spill]] %s3301_s20  ;;  %p4339_p8 = scmp.lt.s32.totalorder %s3077_s28, 4 }
  0x4b   : > { %s4338_s5 = scalar_select %p3306_p6, 1, 0 }
  0x4c   : > { %p3319_p9 = pnand %p4339_p8, %p3271_p13  ;;  %s212_s13 = scalar_lea.vmem [#allocation3], %s2211_s18 }
  0x4d   : > { %s219_s9 = sshll.u32 %s212_s13, 4  ;;  %s3325_s27 = scalar_lea.sflag [#allocation4], %s208_s16  ;;  %s3323_s9 = int_to_ptr.vmem [resolvable:$true] %s219_s9 }
  0x4e   : > { %s2891_s4 = scalar_lea.hbm %s3313_s29, 2048  ;;  %p2893_p12 = pneg %p3319_p9 }
  0x4f   : > { %p2892_p10 = scmp.ne.s32.totalorder %s3313_s29, %s2891_s4  ;;  %s2896_s15 = scalar_lea.hbm %s4298_s0, 4096 }
  0x50   : > { %p2897_p13 = scmp.lt.u32.totalorder %s3313_s29, %s4298_s0  ;;  %p2898_p11 = scmp.lt.u32.totalorder %s2896_s15, %s2891_s4 }
  0x51   : > { %p2894_p2 = pnand %p2893_p12, %p2892_p10  ;;  %p2900_p6 = scmp.lt.u32.totalorder %s2891_s4, %s3313_s29 }
  0x52   : > { %p2899_p8 = por %p2898_p11, %p2897_p13 }
  0x53   : > { %p2895_p4 = pneg %p2894_p2 }
  0x54   : > { %p2901_p3 = por %p2900_p6, %p2899_p8 }
  0x56   : > { %p2902_p0 = pnand %p2901_p3, %p2895_p4 }
  0x58   : > { %2905 = shalt.err (!%p2902_p0)
}
  0x59   : > { %s2906_s16 = scalar_lea.vmem %s3323_s9, 2048  ;;  %s3083_s18 = smov [#allocation3]  }
  0x5a   : > { %p2907_p10 = scmp.ne.s32.totalorder %s3323_s9, %s2906_s16  ;;  %s2911_s13 = sshll.u32 %s3083_s18, 4  ;;  %s2912_s13 = int_to_ptr.vmem [resolvable:$false] %s2911_s13 }
  0x5b   : > { %s2913_s20 = scalar_lea.vmem %s2912_s13, 4096  ;;  %p2914_p5 = scmp.lt.s32.totalorder %s3323_s9, %s2912_s13 }
  0x5c   : > { %p2909_p2 = pnand %p2907_p10, %p2893_p12  ;;  %p2915_p13 = scmp.lt.s32.totalorder %s2913_s20, %s2906_s16 }
  0x5e   : > { %p2910_p1 = pneg %p2909_p2  ;;  %p2916_p11 = por %p2915_p13, %p2914_p5 }
  0x60   : > { %p2917_p6 = pnand %p2916_p11, %p2910_p1 }
  0x62   : > { %2920 = shalt.err (!%p2917_p6)
}
  0x63   : > { %s3084_s23 = smov 64   ;;  %s3085_s4 = smov 4  }
  0x64   : > { %2567 = dma.hbm_to_vmem [thread:$0]  (!%p3319_p9), %s3313_s29, 2048, %s3323_s9, %s3325_s27, %s3084_s23, %s3084_s23, %s3085_s4  }
  0x65   : > { %s2315_s25 = sshll.u32 %s3069_s26, 11  ;;  %s262_s10 = scalar_lea.vmem [#allocation8], %s3202_s11 }
  0x66   : > { %s269_s15 = sshll.u32 %s262_s10, 4  ;;  %s3361_s13 = scalar_lea.hbm %s4301_s3, %s2315_s25  ;;  %s3363_s15 = int_to_ptr.vmem [resolvable:$true] %s269_s15 }
  0x67   : > { %s2921_s20 = scalar_lea.hbm %s3361_s13, 2048  ;;  %p4341_p1 = pneg %p3213_p7 }
  0x68   : > { %p2922_p5 = scmp.ne.s32.totalorder %s3361_s13, %s2921_s20  ;;  %s2926_s29 = scalar_lea.hbm %s4301_s3, 4096 }
  0x69   : > { %p2927_p9 = scmp.lt.u32.totalorder %s3361_s13, %s4301_s3  ;;  %p2928_p12 = scmp.lt.u32.totalorder %s2926_s29, %s2921_s20 }
  0x6a   : > { %p2924_p0 = pnand %p2922_p5, %p4341_p1  ;;  %p2930_p8 = scmp.lt.u32.totalorder %s2921_s20, %s3361_s13 }
  0x6b   : > { %p2929_p4 = por %p2928_p12, %p2927_p9 }
  0x6c   : > { %p2925_p3 = pneg %p2924_p0 }
  0x6d   : > { %p2931_p10 = por %p2930_p8, %p2929_p4 }
  0x6f   : > { %p2932_p2 = pnand %p2931_p10, %p2925_p3 }
  0x71   : > { %2935 = shalt.err (!%p2932_p2)
}
  0x72   : > { %s2936_s25 = scalar_lea.vmem %s3363_s15, 2048  ;;  %p4342_p11 = pmov %p4341_p1 }
  0x73   : > { %p2937_p13 = scmp.ne.s32.totalorder %s3363_s15, %s2936_s25  ;;  %s3086_s10 = smov [#allocation8]  }
  0x74   : > { %s2941_s16 = sshll.u32 %s3086_s10, 4  ;;  %s2942_s16 = int_to_ptr.vmem [resolvable:$false] %s2941_s16 }
  0x75   : > { %p2939_p6 = pnand %p2937_p13, %p4342_p11  ;;  %s2943_s18 = scalar_lea.vmem %s2942_s16, 4096 }
  0x76   : > { %p2944_p1 = scmp.lt.s32.totalorder %s3363_s15, %s2942_s16  ;;  %p2945_p0 = scmp.lt.s32.totalorder %s2943_s18, %s2936_s25 }
  0x77   : > { %p2940_p5 = pneg %p2939_p6 }
  0x78   : > { %p2946_p9 = por %p2945_p0, %p2944_p1 }
  0x7a   : > { %p2947_p12 = pnand %p2946_p9, %p2940_p5 }
  0x7c   : > { %2950 = shalt.err (!%p2947_p12)
}
  0x7d   : > { %2573 = dma.hbm_to_vmem [thread:$0]  (!%p3213_p7), %s3361_s13, 2048, %s3363_s15, %s3220_s6, %s3084_s23, %s3084_s23, %s3085_s4  }
  0x7e   : > { %p4343_p3 = scmp.ne.s32.totalorder %s4329_s8, 0 }
  0x7f   : > { %s3395_s20 = sand.u32 (!%p4343_p3), 1, %s3053_s22   ;;  %p4344_p4 = scmp.ne.s32.totalorder (!%p4343_p3), %s4333_s30, 0 }
  0x80   : > { %281 = sbr.rel (%p4343_p3) target bundleno = 855 (0x357), region = 40  ;;  %s2221_s27 = sshll.u32 (!%p4343_p3), %s3395_s20, 7 }
  0x81   : > { %s284_s11 = scalar_lea.sflag (!%p4343_p3), [#allocation4], %s3395_s20  ;;  %s3399_s29 = scalar_lea.vmem (!%p4343_p3), [#allocation3], %s2221_s27 }
  0x87   : > { %3024 = dma.done.wait (%p4344_p4), %s284_s11, 2048  }
  0x88   : > { %3026 = vsyncadd (%p4344_p4), %s284_s11, 4294965248  ;;  %s292_s7 = sand.u32 1, %s3256_s12   ;;  %s294_s6 = sand.u32 1, %s3041_s19  }
  0x89   : > { %s2222_s8 = sshll.u32 %s294_s6, 7  ;;  %s293_s23 = scalar_lea.sflag [#allocation7], %s292_s7 }
  0x8a   : > { %s3407_s4 = scalar_lea.vmem [#allocation6], %s2222_s8  ;;  %p4345_p7 = scmp.ne.s32.totalorder %s4335_s17, 0 }
  0x8c   : > { %3028 = dma.done.wait (%p4345_p7), %s293_s23, 4096  }
  0x8d   : > { %3030 = vsyncadd (%p4345_p7), %s293_s23, 4294963200  ;;  %s2225_s15 = sshll.u32 %s3061_s24, 1  ;;  %s3420_s1 = scalar_lea.vmem [#allocation8], %s2222_s8 }
  0x8e   : > { %p349_p8 = scmp.lt.s32.totalorder %s2225_s15, 3  ;;  %s3422_s9 = scalar_lea.vmem [#allocation9], %s2221_s27 }
  0x8f   : > { %p2226_p10 = scmp.ne.s32.totalorder %s3061_s24, 0 }
  0x90   : > { %s4371_s15 = smov (!%p349_p8, %s2225_s15), 3  ;;  %v3087_v0 = vmov (!%p2226_p10), 0.0  }
  0x91   : > { %s351_s12 = scalar_lea.vmem %s4300_s2, %s4371_s15  ;;  %359 = sbr.rel (%p2226_p10) target bundleno = 161 (0xa1), region = 56  ;;  %360 = vst [vmem:[#allocation2] sm:$0xff] (!%p2226_p10), %v3087_v0  ;;  %361 = vst [vmem:[#allocation2 + $0x8] sm:$0xff] (!%p2226_p10), %v3087_v0 }
  0x92   : > { %362 = vst [vmem:[#allocation2 + $0x10] sm:$0xff] (!%p2226_p10), %v3087_v0  ;;  %363 = vst [vmem:[#allocation2 + $0x18] sm:$0xff] (!%p2226_p10), %v3087_v0 }
  0x93   : > { %364 = vst [vmem:[#allocation2 + $0x20] sm:$0xff] (!%p2226_p10), %v3087_v0  ;;  %365 = vst [vmem:[#allocation2 + $0x28] sm:$0xff] (!%p2226_p10), %v3087_v0 }
  0x94   : > { %366 = vst [vmem:[#allocation2 + $0x30] sm:$0xff] (!%p2226_p10), %v3087_v0  ;;  %367 = vst [vmem:[#allocation2 + $0x38] sm:$0xff] (!%p2226_p10), %v3087_v0 }
  0x95   : > { %368 = vst [vmem:[#allocation2 + $0x40] sm:$0xff] (!%p2226_p10), %v3087_v0  ;;  %369 = vst [vmem:[#allocation2 + $0x48] sm:$0xff] (!%p2226_p10), %v3087_v0 }
  0x96   : > { %370 = vst [vmem:[#allocation2 + $0x50] sm:$0xff] (!%p2226_p10), %v3087_v0  ;;  %371 = vst [vmem:[#allocation2 + $0x58] sm:$0xff] (!%p2226_p10), %v3087_v0 }
  0x97   : > { %372 = vst [vmem:[#allocation2 + $0x60] sm:$0xff] (!%p2226_p10), %v3087_v0  ;;  %373 = vst [vmem:[#allocation2 + $0x68] sm:$0xff] (!%p2226_p10), %v3087_v0 }
  0x98   : > { %374 = vst [vmem:[#allocation2 + $0x70] sm:$0xff] %v3087_v0  ;;  %375 = vst [vmem:[#allocation2 + $0x78] sm:$0xff] %v3087_v0 }
  0x99   : > { %376 = vst [vmem:[#allocation2 + $0x80] sm:$0xff] %v3087_v0  ;;  %377 = vst [vmem:[#allocation2 + $0x88] sm:$0xff] %v3087_v0 }
  0x9a   : > { %378 = vst [vmem:[#allocation2 + $0x90] sm:$0xff] %v3087_v0  ;;  %379 = vst [vmem:[#allocation2 + $0x98] sm:$0xff] %v3087_v0 }
  0x9b   : > { %380 = vst [vmem:[#allocation2 + $0xa0] sm:$0xff] %v3087_v0  ;;  %381 = vst [vmem:[#allocation2 + $0xa8] sm:$0xff] %v3087_v0 }
  0x9c   : > { %382 = vst [vmem:[#allocation2 + $0xb0] sm:$0xff] %v3087_v0  ;;  %383 = vst [vmem:[#allocation2 + $0xb8] sm:$0xff] %v3087_v0 }
  0x9d   : > { %384 = vst [vmem:[#allocation2 + $0xc0] sm:$0xff] %v3087_v0  ;;  %385 = vst [vmem:[#allocation2 + $0xc8] sm:$0xff] %v3087_v0 }
  0x9e   : > { %386 = vst [vmem:[#allocation2 + $0xd0] sm:$0xff] %v3087_v0  ;;  %387 = vst [vmem:[#allocation2 + $0xd8] sm:$0xff] %v3087_v0 }
  0x9f   : > { %388 = vst [vmem:[#allocation2 + $0xe0] sm:$0xff] %v3087_v0  ;;  %389 = vst [vmem:[#allocation2 + $0xe8] sm:$0xff] %v3087_v0 }
  0xa0   : > { %390 = vst [vmem:[#allocation2 + $0xf0] sm:$0xff] %v3087_v0  ;;  %391 = vst [vmem:[#allocation2 + $0xf8] sm:$0xff] %v3087_v0 }
  0xa1 PF: > { %v2677_v1 = vld [vmem:[%s3407_s4 + $0x4] ss:$8 sps:$4 sm:$0xff]   ;;  %v2679_v2 = vld [vmem:[%s3407_s4] ss:$8 sps:$4 sm:$0xff]   ;;  %v3088_v3 = vmov 0   ;;  %v2703_v20 = vld [vmem:[%s3399_s29 + $0x10] sm:$0xff]   ;;  %v443_v50 = vlaneseq }
  0xa2   : > { %669 = vmatprep.mubr.bf16.mxu0 %v3088_v3  ;;  %637 = vmatprep.subr.bf16.mxu0 %v2677_v1  ;;  %v2680_v4 = vld [vmem:[%s3407_s4 + $0x14] ss:$8 sps:$4 sm:$0xff]   ;;  %v2682_v5 = vld [vmem:[%s3407_s4 + $0x10] ss:$8 sps:$4 sm:$0xff]   ;;  %v2683_v6 = vld [vmem:[%s3407_s4 + $0x24] ss:$8 sps:$4 sm:$0xff]  }
  0xa3   : > { %638 = vmatpush1.bf16.msra.mxu0 %v2679_v2  ;;  %v2685_v7 = vld [vmem:[%s3407_s4 + $0x20] ss:$8 sps:$4 sm:$0xff]   ;;  %v2686_v8 = vld [vmem:[%s3407_s4 + $0x34] ss:$8 sps:$4 sm:$0xff]   ;;  %v2688_v9 = vld [vmem:[%s3407_s4 + $0x30] ss:$8 sps:$4 sm:$0xff]  }
  0xa4   : > { %639 = vmatprep.subr.bf16.mxu0 %v2680_v4  ;;  %v2689_v10 = vld [vmem:[%s3407_s4 + $0x44] ss:$8 sps:$4 sm:$0xff]   ;;  %v2691_v11 = vld [vmem:[%s3407_s4 + $0x40] ss:$8 sps:$4 sm:$0xff]   ;;  %v2692_v12 = vld [vmem:[%s3407_s4 + $0x54] ss:$8 sps:$4 sm:$0xff]  }
  0xa5   : > { %v2694_v13 = vld [vmem:[%s3407_s4 + $0x50] ss:$8 sps:$4 sm:$0xff]   ;;  %v2695_v14 = vld [vmem:[%s3407_s4 + $0x64] ss:$8 sps:$4 sm:$0xff]   ;;  %v2697_v15 = vld [vmem:[%s3407_s4 + $0x60] ss:$8 sps:$4 sm:$0xff]  }
  0xa6   : > { %v2698_v16 = vld [vmem:[%s3407_s4 + $0x74] ss:$8 sps:$4 sm:$0xff]   ;;  %v2700_v17 = vld [vmem:[%s3407_s4 + $0x70] ss:$8 sps:$4 sm:$0xff]   ;;  %v2701_v18 = vld [vmem:[%s3399_s29] sm:$0xff]   ;;  %v444_v51 = vshrl.u32 %v443_v50, 7 }
  0xa7   : > { %640 = vmatpush1.bf16.msra.mxu0 %v2682_v5  ;;  %v2702_v19 = vld [vmem:[%s3399_s29 + $0x8] sm:$0xff]   ;;  %v2704_v21 = vld [vmem:[%s3399_s29 + $0x18] sm:$0xff]   ;;  %v2705_v22 = vld [vmem:[%s3399_s29 + $0x20] sm:$0xff]   ;;  %p2275_p2 = scmp.ne.s32.totalorder %s3061_s24, 1 }
  0xa8   : > { %641 = vmatprep.subr.bf16.mxu0 %v2683_v6  ;;  %v2706_v23 = vld [vmem:[%s3399_s29 + $0x28] sm:$0xff]   ;;  %v2707_v24 = vld [vmem:[%s3399_s29 + $0x30] sm:$0xff]   ;;  %v2708_v25 = vld [vmem:[%s3399_s29 + $0x38] sm:$0xff]   ;;  %v3494_v54 = vsub.s32 0, %v444_v51  ;;  %v449_v55 = vsub.s32 2, %v444_v51  ;;  %s4346_s18 = sld [smem:[#allocation22_spill]] (!%p2275_p2) }
  0xa9   : > { %v2709_v26 = vld [vmem:[%s3399_s29 + $0x40] sm:$0xff]   ;;  %v2710_v27 = vld [vmem:[%s3399_s29 + $0x48] sm:$0xff]   ;;  %v2711_v28 = vld [vmem:[%s3399_s29 + $0x50] sm:$0xff]  }
  0xaa   : > { %v2717_v29 = vld [vmem:[%s3420_s1 + $0x40] sm:$0xff]   ;;  %v2712_v30 = vld [vmem:[%s3399_s29 + $0x58] sm:$0xff]   ;;  %v2719_v32 = vld [vmem:[%s3420_s1 + $0x48] sm:$0xff]  }
  0xab   : > { %642 = vmatpush1.bf16.msra.mxu0 %v2685_v7  ;;  %v2718_v31 = vld [vmem:[%s3420_s1] sm:$0xff]   ;;  %2444 = vmatprep.subr.bf16.mxu1 %v2717_v29  ;;  %v2720_v33 = vld [vmem:[%s3420_s1 + $0x8] sm:$0xff]   ;;  %v2721_v34 = vld [vmem:[%s3420_s1 + $0x50] sm:$0xff]  }
  0xac   : > { %643 = vmatprep.subr.bf16.mxu0 %v2686_v8  ;;  %2445 = vmatpush3.bf16.msra.mxu1 %v2718_v31  ;;  %v2713_v35 = vld [vmem:[%s3399_s29 + $0x60] sm:$0xff]   ;;  %v2722_v36 = vld [vmem:[%s3420_s1 + $0x10] sm:$0xff]   ;;  %v2723_v37 = vld [vmem:[%s3420_s1 + $0x58] sm:$0xff]  }
  0xad   : > { %2446 = vmatprep.subr.bf16.mxu1 %v2719_v32  ;;  %v2724_v38 = vld [vmem:[%s3420_s1 + $0x18] sm:$0xff]   ;;  %v2725_v39 = vld [vmem:[%s3420_s1 + $0x60] sm:$0xff]   ;;  %v2714_v40 = vld [vmem:[%s3399_s29 + $0x68] sm:$0xff]  }
  0xae   : > { %v2726_v41 = vld [vmem:[%s3420_s1 + $0x20] sm:$0xff]   ;;  %v2727_v42 = vld [vmem:[%s3420_s1 + $0x68] sm:$0xff]   ;;  %v2729_v44 = vld [vmem:[%s3420_s1 + $0x70] sm:$0xff]  }
  0xaf   : > { %644 = vmatpush1.bf16.msra.mxu0 %v2688_v9  ;;  %v2728_v43 = vld [vmem:[%s3420_s1 + $0x28] sm:$0xff]   ;;  %v2715_v45 = vld [vmem:[%s3399_s29 + $0x70] sm:$0xff]   ;;  %v2731_v47 = vld [vmem:[%s3420_s1 + $0x78] sm:$0xff]  }
  0xb0   : > { %645 = vmatprep.subr.bf16.mxu0 %v2689_v10  ;;  %2447 = vmatpush3.bf16.msra.mxu1 %v2720_v33  ;;  %v2730_v46 = vld [vmem:[%s3420_s1 + $0x30] sm:$0xff]   ;;  %v2732_v48 = vld [vmem:[%s3420_s1 + $0x38] sm:$0xff]   ;;  %v440_v52 = vld [vmem:[%s351_s12] sm:$0x3] }
  0xb1   : > { %2448 = vmatprep.subr.bf16.mxu1 %v2721_v34  ;;  %v2716_v49 = vld [vmem:[%s3399_s29 + $0x78] sm:$0xff]   ;;  %v441_v53 = vunpack.c.l.bf16 %v440_v52 }
  0xb3   : > { %646 = vmatpush1.bf16.msra.mxu0 %v2691_v11  ;;  %v446_v56 = vrot.slane %v441_v53, %v3494_v54  ;;  %v450_v57 = vrot.slane %v441_v53, %v449_v55 }
  0xb4   : > { %647 = vmatprep.subr.bf16.mxu0 %v2692_v12  ;;  %2449 = vmatpush3.bf16.msra.mxu1 %v2722_v36 }
  0xb5   : > { %2450 = vmatprep.subr.bf16.mxu1 %v2723_v37  ;;  %v3498_v58 = vrot.slane %v446_v56, %v3494_v54  ;;  %v3501_v59 = vrot.slane %v450_v57, %v3494_v54 }
  0xb7   : > { %648 = vmatpush1.bf16.msra.mxu0 %v2694_v13 }
  0xb8   : > { %649 = vmatprep.subr.bf16.mxu0 %v2695_v14  ;;  %2451 = vmatpush3.bf16.msra.mxu1 %v2724_v38 }
  0xb9   : > { %2452 = vmatprep.subr.bf16.mxu1 %v2725_v39 }
  0xbb   : > { %650 = vmatpush1.bf16.msra.mxu0 %v2697_v15 }
  0xbc   : > { %651 = vmatprep.subr.bf16.mxu0 %v2698_v16  ;;  %2453 = vmatpush3.bf16.msra.mxu1 %v2726_v41 }
  0xbd   : > { %2454 = vmatprep.subr.bf16.mxu1 %v2727_v42 }
  0xbf   : > { %652 = vmatpush1.bf16.msra.mxu0 %v2700_v17 }
  0xc0   : > { %2455 = vmatpush3.bf16.msra.mxu1 %v2728_v43 }
  0xc1   : > { %2456 = vmatprep.subr.bf16.mxu1 %v2729_v44 }
  0xc2   : > { %670 = vmatmul.mubr.bf16.vlgmr.msra.gmra.mrb[0].mxu0 %v2701_v18 }
  0xc3   : > { %679 = vmatprep.mubr.bf16.mxu0 %v3088_v3 }
  0xc4   : > { %2457 = vmatpush3.bf16.msra.mxu1 %v2730_v46 }
  0xc5   : > { %2458 = vmatprep.subr.bf16.mxu1 %v2731_v47 }
  0xc8   : > { %2459 = vmatpush3.bf16.msra.mxu1 %v2732_v48 }
  0xca   : > { %680 = vmatmul.mubr.bf16.gmra.mrb[4].mxu0 %v2702_v19 }
  0xcb   : > { %689 = vmatprep.mubr.bf16.mxu0 %v3088_v3 }
  0xd2   : > { %690 = vmatmul.mubr.bf16.gmra.mrb[8].mxu0 %v2703_v20 }
  0xd3   : > { %699 = vmatprep.mubr.bf16.mxu0 %v3088_v3 }
  0xda   : > { %700 = vmatmul.mubr.bf16.gmra.mrb[12].mxu0 %v2704_v21 }
  0xdb   : > { %709 = vmatprep.mubr.bf16.mxu0 %v3088_v3 }
  0xe2   : > { %710 = vmatmul.mubr.bf16.gmra.mrb[16].mxu0 %v2705_v22 }
  0xe3   : > { %719 = vmatprep.mubr.bf16.mxu0 %v3088_v3 }
  0xea   : > { %720 = vmatmul.mubr.bf16.gmra.mrb[20].mxu0 %v2706_v23 }
  0xeb   : > { %729 = vmatprep.mubr.bf16.mxu0 %v3088_v3 }
  0xf2   : > { %730 = vmatmul.mubr.bf16.gmra.mrb[24].mxu0 %v2707_v24 }
  0xf3   : > { %739 = vmatprep.mubr.bf16.mxu0 %v3088_v3 }
  0xfa   : > { %740 = vmatmul.mubr.bf16.gmra.mrb[28].mxu0 %v2708_v25 }
  0xfb   : > { %749 = vmatprep.mubr.bf16.mxu0 %v3088_v3 }
 0x102   : > { %750 = vmatmul.mubr.bf16.gmra.mrb[32].mxu0 %v2709_v26 }
 0x103   : > { %759 = vmatprep.mubr.bf16.mxu0 %v3088_v3 }
 0x10a   : > { %760 = vmatmul.mubr.bf16.gmra.mrb[36].mxu0 %v2710_v27 }
 0x10b   : > { %769 = vmatprep.mubr.bf16.mxu0 %v3088_v3 }
 0x112   : > { %770 = vmatmul.mubr.bf16.gmra.mrb[40].mxu0 %v2711_v28 }
 0x113   : > { %779 = vmatprep.mubr.bf16.mxu0 %v3088_v3 }
 0x11a   : > { %780 = vmatmul.mubr.bf16.gmra.mrb[44].mxu0 %v2712_v30 }
 0x11b   : > { %789 = vmatprep.mubr.bf16.mxu0 %v3088_v3 }
 0x122   : > { %790 = vmatmul.mubr.bf16.gmra.mrb[48].mxu0 %v2713_v35 }
 0x123   : > { %799 = vmatprep.mubr.bf16.mxu0 %v3088_v3 }
 0x12a   : > { %800 = vmatmul.mubr.bf16.gmra.mrb[52].mxu0 %v2714_v40 }
 0x12b   : > { %809 = vmatprep.mubr.bf16.mxu0 %v3088_v3 }
 0x132   : > { %810 = vmatmul.mubr.bf16.gmra.mrb[56].mxu0 %v2715_v45 }
 0x133   : > { %819 = vmatprep.mubr.bf16.mxu0 %v3088_v3 }
 0x13a   : > { %820 = vmatmul.mubr.bf16.gmra.mrb[60].mxu0 %v2716_v49 }
 0x195   : > { %v671_v60 = vpop.f32.mrb[0].mxu0 }
 0x196   : > { %v672_v61 = vadd.f32 %v671_v60, %v3498_v58  ;;  %v673_v62 = vpop.f32.mrb[1].mxu0 }
 0x197   : > { %v674_v63 = vadd.f32 %v673_v62, %v3501_v59  ;;  %v675_v0 = vpop.f32.mrb[2].mxu0 }
 0x198   : > { %v894_v1 = vmul.f32 0.044715, %v672_v61  ;;  %v3506_v2 = vadd.f32 %v675_v0, %v3498_v58  ;;  %v677_v3 = vpop.f32.mrb[3].mxu0  ;;  %v830_v55 = vmul.f32 0.5, %v672_v61 }
 0x199   : > { %v895_v4 = vmul.f32 0.044715, %v674_v63  ;;  %v3509_v5 = vadd.f32 %v677_v3, %v3501_v59  ;;  %v831_v53 = vmul.f32 0.5, %v674_v63 }
 0x19a   : > { %v958_v6 = vmul.f32 %v894_v1, %v672_v61  ;;  %v896_v7 = vmul.f32 0.044715, %v3506_v2 }
 0x19b   : > { %v897_v8 = vmul.f32 0.044715, %v3509_v5  ;;  %v959_v9 = vmul.f32 %v895_v4, %v674_v63 }
 0x19c   : > { %v1022_v10 = vmul.f32 %v958_v6, %v672_v61  ;;  %v960_v11 = vmul.f32 %v896_v7, %v3506_v2 }
 0x19d   : > { %v681_v12 = vpop.f32.mrb[4].mxu0  ;;  %v961_v13 = vmul.f32 %v897_v8, %v3509_v5  ;;  %v1023_v14 = vmul.f32 %v959_v9, %v674_v63  ;;  %v832_v9 = vmul.f32 0.5, %v3506_v2 }
 0x19e   : > { %v1024_v15 = vmul.f32 %v960_v11, %v3506_v2  ;;  %v3517_v16 = vadd.f32 %v681_v12, %v3498_v58  ;;  %v683_v17 = vpop.f32.mrb[5].mxu0  ;;  %v1086_v18 = vadd.f32 %v1022_v10, %v672_v61 }
 0x19f   : > { %v684_v19 = vadd.f32 %v683_v17, %v3501_v59  ;;  %v685_v20 = vpop.f32.mrb[6].mxu0  ;;  %v1025_v21 = vmul.f32 %v961_v13, %v3509_v5  ;;  %v1087_v22 = vadd.f32 %v1023_v14, %v674_v63  ;;  %v833_v63 = vmul.f32 0.5, %v3509_v5 }
 0x1a0   : > { %v898_v23 = vmul.f32 0.044715, %v3517_v16  ;;  %v3523_v24 = vadd.f32 %v685_v20, %v3498_v58  ;;  %v687_v25 = vpop.f32.mrb[7].mxu0  ;;  %v1088_v26 = vadd.f32 %v1024_v15, %v3506_v2  ;;  %v1150_v27 = vmul.f32 0.7978846, %v1086_v18 }
 0x1a1   : > { %v899_v28 = vmul.f32 0.044715, %v684_v19  ;;  %v688_v29 = vadd.f32 %v687_v25, %v3501_v59  ;;  %v1089_v30 = vadd.f32 %v1025_v21, %v3509_v5  ;;  %v1151_v31 = vmul.f32 0.7978846, %v1087_v22 }
 0x1a2   : > { %v962_v32 = vmul.f32 %v898_v23, %v3517_v16  ;;  %v900_v33 = vmul.f32 0.044715, %v3523_v24  ;;  %v1152_v34 = vmul.f32 0.7978846, %v1088_v26  ;;  %2733 = vtanh.f32 %v1150_v27 }
 0x1a3   : > { %v963_v35 = vmul.f32 %v899_v28, %v684_v19  ;;  %v901_v36 = vmul.f32 0.044715, %v688_v29  ;;  %v1153_v37 = vmul.f32 0.7978846, %v1089_v30  ;;  %2735 = vtanh.f32 %v1151_v31 }
 0x1a4   : > { %v1026_v38 = vmul.f32 %v962_v32, %v3517_v16  ;;  %v964_v39 = vmul.f32 %v900_v33, %v3523_v24  ;;  %2737 = vtanh.f32 %v1152_v34  ;;  %v3553_v10 = vmul.f32 0.5, %v684_v19 }
 0x1a5   : > { %v1027_v40 = vmul.f32 %v963_v35, %v684_v19  ;;  %v965_v41 = vmul.f32 %v901_v36, %v688_v29  ;;  %v691_v42 = vpop.f32.mrb[8].mxu0  ;;  %2739 = vtanh.f32 %v1153_v37  ;;  %v837_v22 = vmul.f32 0.5, %v688_v29 }
 0x1a6   : > { %v1028_v43 = vmul.f32 %v964_v39, %v3523_v24  ;;  %v3534_v44 = vadd.f32 %v691_v42, %v3498_v58  ;;  %v693_v45 = vpop.f32.mrb[9].mxu0  ;;  %v1090_v50 = vadd.f32 %v1026_v38, %v3517_v16  ;;  %v834_v31 = vmul.f32 0.5, %v3517_v16 }
 0x1a7   : > { %v1029_v46 = vmul.f32 %v965_v41, %v688_v29  ;;  %v3537_v47 = vadd.f32 %v693_v45, %v3501_v59  ;;  %v695_v48 = vpop.f32.mrb[10].mxu0  ;;  %v1091_v49 = vadd.f32 %v1027_v40, %v684_v19 }
 0x1a8   : > { %v3541_v51 = vadd.f32 %v695_v48, %v3498_v58  ;;  %v697_v52 = vpop.f32.mrb[11].mxu0  ;;  %v1092_v56 = vadd.f32 %v1028_v43, %v3523_v24  ;;  %v902_v1 = vmul.f32 0.044715, %v3534_v44  ;;  %v1154_v3 = vmul.f32 0.7978846, %v1090_v50 }
 0x1a9   : > { %v903_v57 = vmul.f32 0.044715, %v3537_v47  ;;  %v3546_v60 = vadd.f32 %v697_v52, %v3501_v59  ;;  %v1093_v62 = vadd.f32 %v1029_v46, %v688_v29  ;;  %v1155_v0 = vmul.f32 0.7978846, %v1091_v49 }
 0x1aa   : > { %v1156_v4 = vmul.f32 0.7978846, %v1092_v56  ;;  %v904_v12 = vmul.f32 0.044715, %v3541_v51  ;;  %v966_v2 = vmul.f32 %v902_v1, %v3534_v44  ;;  %v836_v29 = vmul.f32 0.5, %v3523_v24 }
 0x1ab   : > { %v967_v6 = vmul.f32 %v903_v57, %v3537_v47  ;;  %v905_v7 = vmul.f32 0.044715, %v3546_v60  ;;  %v1157_v8 = vmul.f32 0.7978846, %v1093_v62  ;;  %2741 = vtanh.f32 %v1155_v0 }
 0x1ac   : > { %v2734_v61 = vpop.eup %2733  ;;  %2743 = vtanh.f32 %v1154_v3  ;;  %v968_v32 = vmul.f32 %v904_v12, %v3541_v51  ;;  %v3574_v39 = vmul.f32 0.5, %v3534_v44  ;;  %v1030_v40 = vmul.f32 %v966_v2, %v3534_v44 }
 0x1ad   : > { %v2736_v11 = vpop.eup %2735  ;;  %v969_v13 = vmul.f32 %v905_v7, %v3546_v60  ;;  %v701_v14 = vpop.f32.mrb[12].mxu0  ;;  %v1278_v15 = vadd.f32 1.0, %v2734_v61  ;;  %2745 = vtanh.f32 %v1157_v8  ;;  %v1031_v18 = vmul.f32 %v967_v6, %v3537_v47 }
 0x1ae   : > { %v2738_v17 = vpop.eup %2737  ;;  %v703_v20 = vpop.f32.mrb[13].mxu0  ;;  %v1279_v21 = vadd.f32 1.0, %v2736_v11  ;;  %2747 = vtanh.f32 %v1156_v4  ;;  %v3561_v23 = vadd.f32 %v701_v14, %v3498_v58  ;;  %v1032_v49 = vmul.f32 %v968_v32, %v3541_v51 }
 0x1af   : > { %v2740_v5 = vpop.eup %2739  ;;  %v1033_v19 = vmul.f32 %v969_v13, %v3546_v60  ;;  %v705_v25 = vpop.f32.mrb[14].mxu0  ;;  %v1280_v26 = vadd.f32 1.0, %v2738_v17  ;;  %v3564_v27 = vadd.f32 %v703_v20, %v3501_v59  ;;  %v1342_v34 = vmul.f32 %v1278_v15, %v830_v55 }
 0x1b0   : > { %v707_v28 = vpop.f32.mrb[15].mxu0  ;;  %v1281_v30 = vadd.f32 1.0, %v2740_v5  ;;  %v1343_v36 = vmul.f32 %v1279_v21, %v831_v53  ;;  %v1095_v38 = vadd.f32 %v1031_v18, %v3537_v47  ;;  %v906_v16 = vmul.f32 0.044715, %v3561_v23 }
 0x1b1   : > { %v3570_v33 = vadd.f32 %v707_v28, %v3501_v59  ;;  %v1344_v35 = vmul.f32 %v1280_v26, %v832_v9  ;;  %v1097_v24 = vadd.f32 %v1033_v19, %v3546_v60  ;;  %v907_v42 = vmul.f32 0.044715, %v3564_v27 }
 0x1b2   : > { %v1345_v37 = vmul.f32 %v1281_v30, %v833_v63  ;;  %v1159_v46 = vmul.f32 0.7978846, %v1095_v38  ;;  %v3583_v50 = vadd.f32 %v705_v25, %v3498_v58  ;;  %v3586_v53 = vmul.f32 0.5, %v3537_v47 }
 0x1b3   : > { %v1438_v41 = vpack.c.bf16 %v1344_v35, %v1342_v34  ;;  %v909_v43 = vmul.f32 0.044715, %v3570_v33  ;;  %v1161_v55 = vmul.f32 0.7978846, %v1097_v24  ;;  %v3592_v1 = vmul.f32 0.5, %v3546_v60 }
 0x1b4   : > { %v1439_v45 = vpack.c.bf16 %v1345_v37, %v1343_v36  ;;  %2749 = vtanh.f32 %v1159_v46  ;;  %v970_v4 = vmul.f32 %v906_v16, %v3561_v23  ;;  %v971_v61 = vmul.f32 %v907_v42, %v3564_v27 }
 0x1b5   : > { %v2742_v48 = vpop.eup %2741  ;;  %v711_v52 = vpop.f32.mrb[16].mxu0  ;;  %2751 = vtanh.f32 %v1161_v55  ;;  %v973_v63 = vmul.f32 %v909_v43, %v3570_v33  ;;  %v908_v12 = vmul.f32 0.044715, %v3583_v50  ;;  %v1094_v21 = vadd.f32 %v1030_v40, %v3534_v44 }
 0x1b6   : > { %v2744_v56 = vpop.eup %2743  ;;  %v3589_v57 = vadd.f32 %v711_v52, %v3498_v58  ;;  %v713_v62 = vpop.f32.mrb[17].mxu0  ;;  %1630 = vmatprep.mubr.bf16.mxu1 %v1439_v45  ;;  %v1283_v0 = vadd.f32 1.0, %v2742_v48  ;;  %v1096_v25 = vadd.f32 %v1032_v49, %v3541_v51  ;;  %v1035_v26 = vmul.f32 %v971_v61, %v3564_v27 }
 0x1b7   : > { %v2746_v3 = vpop.eup %2745  ;;  %v3596_v6 = vadd.f32 %v713_v62, %v3501_v59  ;;  %v715_v47 = vpop.f32.mrb[18].mxu0  ;;  %1631 = vmatmul.mubr.bf16.vlgmr.msra.gmra.mrb[0].mxu1 %v1438_v41  ;;  %v1282_v7 = vadd.f32 1.0, %v2744_v56  ;;  %v1037_v28 = vmul.f32 %v973_v63, %v3570_v33  ;;  %v1158_v32 = vmul.f32 0.7978846, %v1094_v21 }
 0x1b8   : > { %v2748_v8 = vpop.eup %2747  ;;  %v3601_v9 = vadd.f32 %v715_v47, %v3498_v58  ;;  %v717_v60 = vpop.f32.mrb[19].mxu0  ;;  %v1285_v11 = vadd.f32 1.0, %v2746_v3  ;;  %v910_v13 = vmul.f32 0.044715, %v3589_v57  ;;  %v1347_v18 = vmul.f32 %v1283_v0, %v3553_v10 }
 0x1b9   : > { %v3606_v14 = vadd.f32 %v717_v60, %v3501_v59  ;;  %v1284_v15 = vadd.f32 1.0, %v2748_v8  ;;  %v911_v17 = vmul.f32 0.044715, %v3596_v6  ;;  %v1346_v2 = vmul.f32 %v1282_v7, %v834_v31 }
 0x1ba   : > { %v1349_v20 = vmul.f32 %v1285_v11, %v837_v22  ;;  %v912_v5 = vmul.f32 0.044715, %v3601_v9  ;;  %v972_v34 = vmul.f32 %v908_v12, %v3583_v50  ;;  %v1160_v36 = vmul.f32 0.7978846, %v1096_v25 }
 0x1bb   : > { %v1348_v19 = vmul.f32 %v1284_v15, %v836_v29  ;;  %v913_v35 = vmul.f32 0.044715, %v3606_v14  ;;  %v1034_v44 = vmul.f32 %v970_v4, %v3561_v23  ;;  %v974_v31 = vmul.f32 %v910_v13, %v3589_v57 }
 0x1bc   : > { %v1441_v30 = vpack.c.bf16 %v1349_v20, %v1347_v18  ;;  %2753 = vtanh.f32 %v1158_v32  ;;  %v975_v38 = vmul.f32 %v911_v17, %v3596_v6  ;;  %v976_v40 = vmul.f32 %v912_v5, %v3601_v9 }
 0x1bd   : > { %v721_v10 = vpop.f32.mrb[20].mxu0  ;;  %v1440_v22 = vpack.c.bf16 %v1348_v19, %v1346_v2  ;;  %2755 = vtanh.f32 %v1160_v36  ;;  %v840_v45 = vmul.f32 0.5, %v3541_v51  ;;  %v1099_v46 = vadd.f32 %v1035_v26, %v3564_v27 }
 0x1be   : > { %v3620_v29 = vadd.f32 %v721_v10, %v3498_v58  ;;  %v723_v37 = vpop.f32.mrb[21].mxu0  ;;  %1638 = vmatprep.mubr.bf16.mxu1 %v1441_v30  ;;  %v2750_v24 = vpop.eup %2749  ;;  %v1101_v48 = vadd.f32 %v1037_v28, %v3570_v33  ;;  %v1036_v52 = vmul.f32 %v972_v34, %v3583_v50  ;;  %v977_v55 = vmul.f32 %v913_v35, %v3606_v14 }
 0x1bf   : > { %v3625_v16 = vadd.f32 %v723_v37, %v3501_v59  ;;  %v725_v41 = vpop.f32.mrb[22].mxu0  ;;  %1639 = vmatmul.mubr.bf16.gmra.mrb[4].mxu1 %v1440_v22  ;;  %v2752_v49 = vpop.eup %2751  ;;  %v1287_v62 = vadd.f32 1.0, %v2750_v24  ;;  %v3639_v0 = vmul.f32 %v974_v31, %v3589_v57  ;;  %v1163_v51 = vmul.f32 0.7978846, %v1099_v46 }
 0x1c0   : > { %v3628_v42 = vadd.f32 %v725_v41, %v3498_v58  ;;  %v727_v43 = vpop.f32.mrb[23].mxu0  ;;  %v914_v3 = vmul.f32 0.044715, %v3620_v29  ;;  %v1289_v4 = vadd.f32 1.0, %v2752_v49  ;;  %v1039_v47 = vmul.f32 %v975_v38, %v3596_v6 }
 0x1c1   : > { %v3636_v56 = vadd.f32 %v727_v43, %v3501_v59  ;;  %v3644_v7 = vmul.f32 %v976_v40, %v3601_v9  ;;  %v915_v8 = vmul.f32 0.044715, %v3625_v16  ;;  %v1165_v61 = vmul.f32 0.7978846, %v1101_v48 }
 0x1c2   : > { %v916_v63 = vmul.f32 0.044715, %v3628_v42  ;;  %v1351_v60 = vmul.f32 %v1287_v62, %v3586_v53  ;;  %v1353_v11 = vmul.f32 %v1289_v4, %v3592_v1  ;;  %2757 = vtanh.f32 %v1163_v51 }
 0x1c3   : > { %v1041_v12 = vmul.f32 %v977_v55, %v3606_v14  ;;  %v917_v13 = vmul.f32 0.044715, %v3636_v56  ;;  %v3653_v17 = vmul.f32 0.5, %v3564_v27  ;;  %2759 = vtanh.f32 %v1165_v61 }
 0x1c4   : > { %v978_v18 = vmul.f32 %v914_v3, %v3620_v29  ;;  %v1443_v5 = vpack.c.bf16 %v1353_v11, %v1351_v60  ;;  %v1098_v53 = vadd.f32 %v1034_v44, %v3561_v23  ;;  %v979_v1 = vmul.f32 %v915_v8, %v3625_v16 }
 0x1c5   : > { %v731_v15 = vpop.f32.mrb[24].mxu0  ;;  %v845_v25 = vmul.f32 0.5, %v3570_v33  ;;  %v1100_v27 = vadd.f32 %v1036_v52, %v3583_v50  ;;  %v980_v28 = vmul.f32 %v916_v63, %v3628_v42  ;;  %v3671_v34 = vmul.f32 0.5, %v3561_v23 }
 0x1c6   : > { %v3657_v20 = vadd.f32 %v731_v15, %v3498_v58  ;;  %v733_v21 = vpop.f32.mrb[25].mxu0  ;;  %v2754_v26 = vpop.eup %2753  ;;  %1646 = vmatprep.mubr.bf16.mxu1 %v1443_v5  ;;  %v1162_v35 = vmul.f32 0.7978846, %v1098_v53  ;;  %v981_v22 = vmul.f32 %v917_v13, %v3636_v56  ;;  %v3678_v31 = vmul.f32 %v978_v18, %v3620_v29 }
 0x1c7   : > { %v3662_v2 = vadd.f32 %v733_v21, %v3501_v59  ;;  %v735_v19 = vpop.f32.mrb[26].mxu0  ;;  %v2756_v10 = vpop.eup %2755  ;;  %v1286_v36 = vadd.f32 1.0, %v2754_v26  ;;  %v1164_v44 = vmul.f32 0.7978846, %v1100_v27  ;;  %v3682_v40 = vmul.f32 %v979_v1, %v3625_v16 }
 0x1c8   : > { %v3668_v30 = vadd.f32 %v735_v19, %v3498_v58  ;;  %v737_v32 = vpop.f32.mrb[27].mxu0  ;;  %v918_v37 = vmul.f32 0.044715, %v3657_v20  ;;  %v1288_v38 = vadd.f32 1.0, %v2756_v10  ;;  %2761 = vtanh.f32 %v1162_v35 }
 0x1c9   : > { %v3675_v33 = vadd.f32 %v737_v32, %v3501_v59  ;;  %v919_v23 = vmul.f32 0.044715, %v3662_v2  ;;  %2763 = vtanh.f32 %v1164_v44  ;;  %v1350_v24 = vmul.f32 %v1286_v36, %v3574_v39 }
 0x1ca   : > { %v920_v41 = vmul.f32 0.044715, %v3668_v30  ;;  %v1352_v43 = vmul.f32 %v1288_v38, %v840_v45  ;;  %v1103_v48 = vadd.f32 %v1039_v47, %v3596_v6  ;;  %v3690_v49 = vmul.f32 %v980_v28, %v3628_v42 }
 0x1cb   : > { %v921_v46 = vmul.f32 0.044715, %v3675_v33  ;;  %v3693_v52 = vmul.f32 %v981_v22, %v3636_v56  ;;  %v844_v62 = vmul.f32 0.5, %v3583_v50  ;;  %v1105_v3 = vadd.f32 %v1041_v12, %v3606_v14 }
 0x1cc   : > { %v2758_v4 = vpop.eup %2757  ;;  %v982_v51 = vmul.f32 %v918_v37, %v3657_v20  ;;  %v1442_v39 = vpack.c.bf16 %v1352_v43, %v1350_v24  ;;  %v1167_v47 = vmul.f32 0.7978846, %v1103_v48  ;;  %v983_v63 = vmul.f32 %v919_v23, %v3662_v2 }
 0x1cd   : > { %v741_v55 = vpop.f32.mrb[28].mxu0  ;;  %v2760_v61 = vpop.eup %2759  ;;  %v1291_v11 = vadd.f32 1.0, %v2758_v4  ;;  %v1169_v50 = vmul.f32 0.7978846, %v1105_v3  ;;  %v984_v12 = vmul.f32 %v920_v41, %v3668_v30  ;;  %v985_v15 = vmul.f32 %v921_v46, %v3675_v33 }
 0x1ce   : > { %v3699_v45 = vadd.f32 %v741_v55, %v3498_v58  ;;  %v743_v8 = vpop.f32.mrb[29].mxu0  ;;  %1647 = vmatmul.mubr.bf16.gmra.mrb[8].mxu1 %v1442_v39  ;;  %v1293_v18 = vadd.f32 1.0, %v2760_v61  ;;  %2765 = vtanh.f32 %v1167_v47  ;;  %v847_v53 = vmul.f32 0.5, %v3596_v6 }
 0x1cf   : > { %v3703_v60 = vadd.f32 %v743_v8, %v3501_v59  ;;  %v745_v13 = vpop.f32.mrb[30].mxu0  ;;  %v849_v1 = vmul.f32 0.5, %v3606_v14  ;;  %2767 = vtanh.f32 %v1169_v50  ;;  %v3711_v19 = vmul.f32 %v982_v51, %v3657_v20 }
 0x1d0   : > { %v747_v21 = vpop.f32.mrb[31].mxu0  ;;  %v922_v5 = vmul.f32 0.044715, %v3699_v45  ;;  %v1355_v27 = vmul.f32 %v1291_v11, %v3653_v17  ;;  %v1357_v26 = vmul.f32 %v1293_v18, %v845_v25  ;;  %v3715_v28 = vadd.f32 %v745_v13, %v3498_v58 }
 0x1d1   : > { %v3718_v32 = vmul.f32 %v983_v63, %v3662_v2  ;;  %v923_v35 = vmul.f32 0.044715, %v3703_v60  ;;  %v1102_v6 = vadd.f32 %v3639_v0, %v3589_v57  ;;  %v1104_v14 = vadd.f32 %v3644_v7, %v3601_v9 }
 0x1d2   : > { %v2762_v10 = vpop.eup %2761  ;;  %v3726_v22 = vmul.f32 %v984_v12, %v3668_v30  ;;  %v3729_v17 = vmul.f32 %v985_v15, %v3675_v33  ;;  %v1445_v25 = vpack.c.bf16 %v1357_v26, %v1355_v27  ;;  %v3732_v36 = vmul.f32 0.5, %v3589_v57 }
 0x1d3   : > { %v2764_v44 = vpop.eup %2763  ;;  %v986_v37 = vmul.f32 %v922_v5, %v3699_v45  ;;  %v1290_v38 = vadd.f32 1.0, %v2762_v10  ;;  %v3736_v0 = vadd.f32 %v747_v21, %v3501_v59  ;;  %v1166_v7 = vmul.f32 0.7978846, %v1102_v6 }
 0x1d4   : > { %1654 = vmatprep.mubr.bf16.mxu1 %v1445_v25  ;;  %v924_v41 = vmul.f32 0.044715, %v3715_v28  ;;  %v1292_v24 = vadd.f32 1.0, %v2764_v44  ;;  %v1168_v48 = vmul.f32 0.7978846, %v1104_v14  ;;  %v987_v57 = vmul.f32 %v923_v35, %v3703_v60 }
 0x1d5   : > { %v751_v23 = vpop.f32.mrb[32].mxu0  ;;  %v3747_v4 = vmul.f32 0.5, %v3601_v9  ;;  %2769 = vtanh.f32 %v1166_v7  ;;  %v1354_v51 = vmul.f32 %v1290_v38, %v3671_v34  ;;  %v925_v61 = vmul.f32 0.044715, %v3736_v0 }
 0x1d6   : > { %v3740_v43 = vadd.f32 %v751_v23, %v3498_v58  ;;  %v753_v46 = vpop.f32.mrb[33].mxu0  ;;  %v1356_v39 = vmul.f32 %v1292_v24, %v844_v62  ;;  %2771 = vtanh.f32 %v1168_v48  ;;  %v1107_v9 = vadd.f32 %v3682_v40, %v3625_v16 }
 0x1d7   : > { %v3744_v55 = vadd.f32 %v753_v46, %v3501_v59  ;;  %v755_v3 = vpop.f32.mrb[34].mxu0  ;;  %v1109_v12 = vadd.f32 %v3693_v52, %v3636_v56  ;;  %v988_v18 = vmul.f32 %v924_v41, %v3715_v28  ;;  %v3767_v26 = vmul.f32 %v986_v37, %v3699_v45 }
 0x1d8   : > { %v3751_v8 = vadd.f32 %v755_v3, %v3498_v58  ;;  %v757_v47 = vpop.f32.mrb[35].mxu0  ;;  %v926_v63 = vmul.f32 0.044715, %v3740_v43  ;;  %v2766_v13 = vpop.eup %2765  ;;  %v1444_v50 = vpack.c.bf16 %v1356_v39, %v1354_v51  ;;  %v1171_v27 = vmul.f32 0.7978846, %v1107_v9 }
 0x1d9   : > { %v3756_v11 = vadd.f32 %v757_v47, %v3501_v59  ;;  %v927_v34 = vmul.f32 0.044715, %v3744_v55  ;;  %v2768_v15 = vpop.eup %2767  ;;  %v1295_v21 = vadd.f32 1.0, %v2766_v13  ;;  %v3770_v35 = vmul.f32 0.5, %v3625_v16 }
 0x1da   : > { %v928_v62 = vmul.f32 0.044715, %v3751_v8  ;;  %1655 = vmatmul.mubr.bf16.gmra.mrb[12].mxu1 %v1444_v50  ;;  %v1297_v40 = vadd.f32 1.0, %v2768_v15  ;;  %v1173_v6 = vmul.f32 0.7978846, %v1109_v12  ;;  %v3773_v14 = vmul.f32 %v987_v57, %v3703_v60 }
 0x1db   : > { %v929_v5 = vmul.f32 0.044715, %v3756_v11  ;;  %v989_v52 = vmul.f32 %v925_v61, %v3736_v0  ;;  %v990_v10 = vmul.f32 %v926_v63, %v3740_v43  ;;  %2773 = vtanh.f32 %v1171_v27 }
 0x1dc   : > { %v1359_v44 = vmul.f32 %v1295_v21, %v847_v53  ;;  %v1361_v38 = vmul.f32 %v1297_v40, %v849_v1  ;;  %2775 = vtanh.f32 %v1173_v6  ;;  %v3781_v16 = vmul.f32 %v988_v18, %v3715_v28 }
 0x1dd   : > { %v761_v25 = vpop.f32.mrb[36].mxu0  ;;  %v991_v7 = vmul.f32 %v927_v34, %v3744_v55  ;;  %v992_v41 = vmul.f32 %v928_v62, %v3751_v8  ;;  %v993_v24 = vmul.f32 %v929_v5, %v3756_v11  ;;  %v1106_v1 = vadd.f32 %v3678_v31, %v3620_v29 }
 0x1de   : > { %v3778_v37 = vadd.f32 %v761_v25, %v3498_v58  ;;  %v763_v23 = vpop.f32.mrb[37].mxu0  ;;  %v1447_v48 = vpack.c.bf16 %v1361_v38, %v1359_v44  ;;  %v3795_v39 = vmul.f32 %v989_v52, %v3736_v0  ;;  %v853_v47 = vmul.f32 0.5, %v3636_v56 }
 0x1df   : > { %v765_v46 = vpop.f32.mrb[38].mxu0  ;;  %v3787_v57 = vadd.f32 %v763_v23, %v3501_v59  ;;  %v2770_v51 = vpop.eup %2769  ;;  %v1108_v61 = vadd.f32 %v3690_v49, %v3628_v42  ;;  %v3804_v13 = vmul.f32 %v990_v10, %v3740_v43  ;;  %v1170_v34 = vmul.f32 0.7978846, %v1106_v1 }
 0x1e0   : > { %v3790_v53 = vadd.f32 %v765_v46, %v3498_v58  ;;  %v767_v3 = vpop.f32.mrb[39].mxu0  ;;  %v2772_v9 = vpop.eup %2771  ;;  %1662 = vmatprep.mubr.bf16.mxu1 %v1447_v48  ;;  %v1294_v50 = vadd.f32 1.0, %v2770_v51  ;;  %v930_v31 = vmul.f32 0.044715, %v3778_v37  ;;  %v3808_v62 = vmul.f32 %v991_v7, %v3744_v55 }
 0x1e1   : > { %v3801_v63 = vadd.f32 %v767_v3, %v3501_v59  ;;  %v3811_v56 = vmul.f32 %v992_v41, %v3751_v8  ;;  %v1296_v12 = vadd.f32 1.0, %v2772_v9  ;;  %v1172_v49 = vmul.f32 0.7978846, %v1108_v61 }
 0x1e2   : > { %v3814_v15 = vmul.f32 %v993_v24, %v3756_v11  ;;  %v931_v18 = vmul.f32 0.044715, %v3787_v57  ;;  %v932_v21 = vmul.f32 0.044715, %v3790_v53  ;;  %2777 = vtanh.f32 %v1170_v34 }
 0x1e3   : > { %v1358_v5 = vmul.f32 %v1294_v50, %v3732_v36  ;;  %v1360_v27 = vmul.f32 %v1296_v12, %v3747_v4  ;;  %2779 = vtanh.f32 %v1172_v49  ;;  %v933_v40 = vmul.f32 0.044715, %v3801_v63 }
 0x1e4   : > { %v994_v52 = vmul.f32 %v930_v31, %v3778_v37  ;;  %v850_v10 = vmul.f32 0.5, %v3620_v29  ;;  %v1111_v38 = vadd.f32 %v3718_v32, %v3662_v2  ;;  %v852_v36 = vmul.f32 0.5, %v3628_v42 }
 0x1e5   : > { %v771_v6 = vpop.f32.mrb[40].mxu0  ;;  %v2774_v23 = vpop.eup %2773  ;;  %v1446_v7 = vpack.c.bf16 %v1360_v27, %v1358_v5  ;;  %v1113_v41 = vadd.f32 %v3729_v17, %v3675_v33  ;;  %v995_v29 = vmul.f32 %v931_v18, %v3787_v57  ;;  %v996_v1 = vmul.f32 %v932_v21, %v3790_v53 }
 0x1e6   : > { %v3824_v25 = vadd.f32 %v771_v6, %v3498_v58  ;;  %v773_v44 = vpop.f32.mrb[41].mxu0  ;;  %v2776_v46 = vpop.eup %2775  ;;  %v1299_v48 = vadd.f32 1.0, %v2774_v23  ;;  %v1175_v3 = vmul.f32 0.7978846, %v1111_v38  ;;  %v997_v61 = vmul.f32 %v933_v40, %v3801_v63 }
 0x1e7   : > { %v3830_v4 = vadd.f32 %v773_v44, %v3501_v59  ;;  %v775_v24 = vpop.f32.mrb[42].mxu0  ;;  %1663 = vmatmul.mubr.bf16.gmra.mrb[16].mxu1 %v1446_v7  ;;  %v1301_v32 = vadd.f32 1.0, %v2776_v46  ;;  %v3838_v42 = vmul.f32 0.5, %v3662_v2  ;;  %v1177_v9 = vmul.f32 0.7978846, %v1113_v41 }
 0x1e8   : > { %v777_v51 = vpop.f32.mrb[43].mxu0  ;;  %v3841_v50 = vmul.f32 %v994_v52, %v3778_v37  ;;  %v934_v17 = vmul.f32 0.044715, %v3824_v25  ;;  %2781 = vtanh.f32 %v1175_v3  ;;  %v3845_v31 = vadd.f32 %v775_v24, %v3498_v58 }
 0x1e9   : > { %v1363_v34 = vmul.f32 %v1299_v48, %v3770_v35  ;;  %v1365_v12 = vmul.f32 %v1301_v32, %v853_v47  ;;  %v935_v49 = vmul.f32 0.044715, %v3830_v4  ;;  %2783 = vtanh.f32 %v1177_v9 }
 0x1ea   : > { %v3850_v18 = vmul.f32 %v995_v29, %v3787_v57  ;;  %v3853_v2 = vmul.f32 %v996_v1, %v3790_v53  ;;  %v1110_v21 = vadd.f32 %v3711_v19, %v3657_v20  ;;  %v1112_v5 = vadd.f32 %v3726_v22, %v3668_v30 }
 0x1eb   : > { %v1449_v27 = vpack.c.bf16 %v1365_v12, %v1363_v34  ;;  %v3860_v40 = vmul.f32 %v997_v61, %v3801_v63  ;;  %v857_v35 = vmul.f32 0.5, %v3675_v33  ;;  %v3864_v47 = vadd.f32 %v777_v51, %v3501_v59 }
 0x1ec   : > { %v2778_v52 = vpop.eup %2777  ;;  %v998_v44 = vmul.f32 %v934_v17, %v3824_v25  ;;  %v1174_v38 = vmul.f32 0.7978846, %v1110_v21  ;;  %v1176_v23 = vmul.f32 0.7978846, %v1112_v5  ;;  %v999_v24 = vmul.f32 %v935_v49, %v3830_v4 }
 0x1ed   : > { %v781_v6 = vpop.f32.mrb[44].mxu0  ;;  %v2780_v22 = vpop.eup %2779  ;;  %1670 = vmatprep.mubr.bf16.mxu1 %v1449_v27  ;;  %v1298_v41 = vadd.f32 1.0, %v2778_v52  ;;  %v936_v33 = vmul.f32 0.044715, %v3845_v31  ;;  %v3876_v1 = vmul.f32 0.5, %v3657_v20  ;;  %v1115_v3 = vadd.f32 %v3773_v14, %v3703_v60 }
 0x1ee   : > { %v3868_v19 = vadd.f32 %v781_v6, %v3498_v58  ;;  %v783_v7 = vpop.f32.mrb[45].mxu0  ;;  %v1300_v48 = vadd.f32 1.0, %v2780_v22  ;;  %2785 = vtanh.f32 %v1174_v38  ;;  %v3881_v32 = vmul.f32 0.5, %v3668_v30 }
 0x1ef   : > { %v3873_v46 = vadd.f32 %v783_v7, %v3501_v59  ;;  %v785_v29 = vpop.f32.mrb[46].mxu0  ;;  %2787 = vtanh.f32 %v1176_v23  ;;  %v937_v61 = vmul.f32 0.044715, %v3864_v47  ;;  %v1362_v17 = vmul.f32 %v1298_v41, %v850_v10 }
 0x1f0   : > { %v787_v51 = vpop.f32.mrb[47].mxu0  ;;  %v938_v9 = vmul.f32 0.044715, %v3868_v19  ;;  %v1364_v34 = vmul.f32 %v1300_v48, %v852_v36  ;;  %v1117_v12 = vadd.f32 %v3795_v39, %v3736_v0  ;;  %v1179_v20 = vmul.f32 0.7978846, %v1115_v3 }
 0x1f1   : > { %v3888_v49 = vmul.f32 %v998_v44, %v3824_v25  ;;  %v3891_v14 = vmul.f32 %v999_v24, %v3830_v4  ;;  %v1000_v30 = vmul.f32 %v936_v33, %v3845_v31  ;;  %v939_v21 = vmul.f32 0.044715, %v3873_v46 }
 0x1f2   : > { %v2782_v5 = vpop.eup %2781  ;;  %v1448_v27 = vpack.c.bf16 %v1364_v34, %v1362_v17  ;;  %v3896_v6 = vmul.f32 0.5, %v3703_v60  ;;  %v1181_v10 = vmul.f32 0.7978846, %v1117_v12  ;;  %2789 = vtanh.f32 %v1179_v20 }
 0x1f3   : > { %v2784_v36 = vpop.eup %2783  ;;  %v1303_v39 = vadd.f32 1.0, %v2782_v5  ;;  %v1001_v52 = vmul.f32 %v937_v61, %v3864_v47  ;;  %v1002_v44 = vmul.f32 %v938_v9, %v3868_v19  ;;  %v3901_v38 = vadd.f32 %v785_v29, %v3498_v58 }
 0x1f4   : > { %1671 = vmatmul.mubr.bf16.gmra.mrb[20].mxu1 %v1448_v27  ;;  %v1305_v7 = vadd.f32 1.0, %v2784_v36  ;;  %2791 = vtanh.f32 %v1181_v10  ;;  %v1114_v22 = vadd.f32 %v3767_v26, %v3699_v45  ;;  %v1116_v60 = vadd.f32 %v3781_v16, %v3715_v28 }
 0x1f5   : > { %v791_v23 = vpop.f32.mrb[48].mxu0  ;;  %v3908_v24 = vmul.f32 %v1000_v30, %v3845_v31  ;;  %v1003_v33 = vmul.f32 %v939_v21, %v3873_v46  ;;  %v3912_v48 = vadd.f32 %v787_v51, %v3501_v59  ;;  %v1367_v61 = vmul.f32 %v1303_v39, %v3838_v42 }
 0x1f6   : > { %v793_v41 = vpop.f32.mrb[49].mxu0  ;;  %v3915_v29 = vadd.f32 %v791_v23, %v3498_v58  ;;  %v1369_v9 = vmul.f32 %v1305_v7, %v857_v35  ;;  %v1178_v26 = vmul.f32 0.7978846, %v1114_v22  ;;  %v1180_v17 = vmul.f32 0.7978846, %v1116_v60 }
 0x1f7   : > { %v795_v3 = vpop.f32.mrb[50].mxu0  ;;  %v3919_v16 = vmul.f32 %v1001_v52, %v3864_v47  ;;  %v861_v12 = vmul.f32 0.5, %v3736_v0  ;;  %v940_v20 = vmul.f32 0.044715, %v3901_v38  ;;  %v3924_v51 = vadd.f32 %v793_v41, %v3501_v59 }
 0x1f8   : > { %v797_v34 = vpop.f32.mrb[51].mxu0  ;;  %v2786_v30 = vpop.eup %2785  ;;  %v1451_v21 = vpack.c.bf16 %v1369_v9, %v1367_v61  ;;  %v3927_v5 = vmul.f32 %v1002_v44, %v3868_v19  ;;  %v3930_v42 = vmul.f32 0.5, %v3699_v45  ;;  %2793 = vtanh.f32 %v1178_v26 }
 0x1f9   : > { %v2788_v35 = vpop.eup %2787  ;;  %v1302_v27 = vadd.f32 1.0, %v2786_v30  ;;  %2795 = vtanh.f32 %v1180_v17  ;;  %v941_v10 = vmul.f32 0.044715, %v3912_v48  ;;  %v942_v0 = vmul.f32 0.044715, %v3915_v29 }
 0x1fa   : > { %1678 = vmatprep.mubr.bf16.mxu1 %v1451_v21  ;;  %v1304_v36 = vadd.f32 1.0, %v2788_v35  ;;  %v3935_v39 = vmul.f32 %v1003_v33, %v3873_v46  ;;  %v1119_v52 = vadd.f32 %v3808_v62, %v3744_v55  ;;  %v1121_v45 = vadd.f32 %v3814_v15, %v3756_v11 }
 0x1fb   : > { %v1004_v44 = vmul.f32 %v940_v20, %v3901_v38  ;;  %v860_v23 = vmul.f32 0.5, %v3715_v28  ;;  %v943_v7 = vmul.f32 0.044715, %v3924_v51  ;;  %v3945_v22 = vadd.f32 %v795_v3, %v3498_v58 }
 0x1fc   : > { %v2790_v41 = vpop.eup %2789  ;;  %v1366_v33 = vmul.f32 %v1302_v27, %v3876_v1  ;;  %v1368_v61 = vmul.f32 %v1304_v36, %v3881_v32  ;;  %v1183_v9 = vmul.f32 0.7978846, %v1119_v52  ;;  %v1185_v62 = vmul.f32 0.7978846, %v1121_v45 }
 0x1fd   : > { %v801_v60 = vpop.f32.mrb[52].mxu0  ;;  %v1307_v17 = vadd.f32 1.0, %v2790_v41  ;;  %v1005_v15 = vmul.f32 %v941_v10, %v3912_v48  ;;  %v1006_v20 = vmul.f32 %v942_v0, %v3915_v29  ;;  %v944_v28 = vmul.f32 0.044715, %v3945_v22 }
 0x1fe   : > { %v803_v26 = vpop.f32.mrb[53].mxu0  ;;  %v2792_v21 = vpop.eup %2791  ;;  %v1450_v3 = vpack.c.bf16 %v1368_v61, %v1366_v33  ;;  %2797 = vtanh.f32 %v1183_v9  ;;  %v1118_v35 = vadd.f32 %v3804_v13, %v3740_v43  ;;  %v1120_v1 = vadd.f32 %v3811_v56, %v3751_v8 }
 0x1ff   : > { %v805_v30 = vpop.f32.mrb[54].mxu0  ;;  %v1309_v27 = vadd.f32 1.0, %v2792_v21  ;;  %v3957_v36 = vmul.f32 %v1004_v44, %v3901_v38  ;;  %v3960_v10 = vmul.f32 0.5, %v3744_v55  ;;  %2799 = vtanh.f32 %v1185_v62 }
 0x200   : > { %v807_v32 = vpop.f32.mrb[55].mxu0  ;;  %1679 = vmatmul.mubr.bf16.gmra.mrb[24].mxu1 %v1450_v3  ;;  %v1007_v0 = vmul.f32 %v943_v7, %v3924_v51  ;;  %v1182_v52 = vmul.f32 0.7978846, %v1118_v35  ;;  %v1184_v45 = vmul.f32 0.7978846, %v1120_v1  ;;  %v3964_v41 = vadd.f32 %v797_v34, %v3501_v59 }
 0x201   : > { %v1371_v13 = vmul.f32 %v1307_v17, %v3896_v6  ;;  %v1373_v56 = vmul.f32 %v1309_v27, %v861_v12  ;;  %v3968_v33 = vmul.f32 %v1005_v15, %v3912_v48  ;;  %v865_v44 = vmul.f32 0.5, %v3756_v11 }
 0x202   : > { %v2794_v61 = vpop.eup %2793  ;;  %v3972_v55 = vmul.f32 %v1006_v20, %v3915_v29  ;;  %v1008_v9 = vmul.f32 %v944_v28, %v3945_v22  ;;  %2801 = vtanh.f32 %v1182_v52  ;;  %v3976_v7 = vadd.f32 %v801_v60, %v3498_v58 }
 0x203   : > { %v2796_v34 = vpop.eup %2795  ;;  %v1453_v62 = vpack.c.bf16 %v1373_v56, %v1371_v13  ;;  %v1306_v21 = vadd.f32 1.0, %v2794_v61  ;;  %2803 = vtanh.f32 %v1184_v45  ;;  %v3979_v6 = vadd.f32 %v803_v26, %v3501_v59 }
 0x204   : > { %v1308_v17 = vadd.f32 1.0, %v2796_v34  ;;  %v3982_v11 = vmul.f32 %v1007_v0, %v3924_v51  ;;  %v945_v15 = vmul.f32 0.044715, %v3964_v41  ;;  %v1123_v20 = vadd.f32 %v3850_v18, %v3787_v57 }
 0x205   : > { %v811_v12 = vpop.f32.mrb[56].mxu0  ;;  %1686 = vmatprep.mubr.bf16.mxu1 %v1453_v62  ;;  %v862_v60 = vmul.f32 0.5, %v3740_v43  ;;  %v864_v3 = vmul.f32 0.5, %v3751_v8  ;;  %v1125_v26 = vadd.f32 %v3860_v40, %v3801_v63  ;;  %v3992_v35 = vadd.f32 %v805_v30, %v3498_v58 }
 0x206   : > { %v813_v28 = vpop.f32.mrb[57].mxu0  ;;  %v1370_v27 = vmul.f32 %v1306_v21, %v3930_v42  ;;  %v1372_v0 = vmul.f32 %v1308_v17, %v860_v23  ;;  %v946_v52 = vmul.f32 0.044715, %v3976_v7  ;;  %v1187_v45 = vmul.f32 0.7978846, %v1123_v20 }
 0x207   : > { %v815_v1 = vpop.f32.mrb[58].mxu0  ;;  %v3999_v13 = vmul.f32 %v1008_v9, %v3945_v22  ;;  %v947_v43 = vmul.f32 0.044715, %v3979_v6  ;;  %v4003_v8 = vmul.f32 0.5, %v3787_v57  ;;  %v1189_v40 = vmul.f32 0.7978846, %v1125_v26 }
 0x208   : > { %v3996_v18 = vpop.f32.mrb[59].mxu0  ;;  %v2798_v30 = vpop.eup %2797  ;;  %v1452_v56 = vpack.c.bf16 %v1372_v0, %v1370_v27  ;;  %v1009_v61 = vmul.f32 %v945_v15, %v3964_v41  ;;  %2805 = vtanh.f32 %v1187_v45  ;;  %v1122_v42 = vadd.f32 %v3841_v50, %v3778_v37 }
 0x209   : > { %v2800_v23 = vpop.eup %2799  ;;  %v1311_v34 = vadd.f32 1.0, %v2798_v30  ;;  %2807 = vtanh.f32 %v1189_v40  ;;  %v948_v9 = vmul.f32 0.044715, %v3992_v35  ;;  %v1124_v62 = vadd.f32 %v3853_v2, %v3790_v53 }
 0x20a   : > { %1687 = vmatmul.mubr.bf16.gmra.mrb[28].mxu1 %v1452_v56  ;;  %v1313_v57 = vadd.f32 1.0, %v2800_v23  ;;  %v1010_v21 = vmul.f32 %v946_v52, %v3976_v7  ;;  %v1186_v17 = vmul.f32 0.7978846, %v1122_v42  ;;  %v4013_v20 = vadd.f32 %v807_v32, %v3501_v59 }
 0x20b   : > { %v1011_v15 = vmul.f32 %v947_v43, %v3979_v6  ;;  %v869_v50 = vmul.f32 0.5, %v3801_v63  ;;  %v1188_v26 = vmul.f32 0.7978846, %v1124_v62  ;;  %v4018_v27 = vadd.f32 %v811_v12, %v3498_v58 }
 0x20c   : > { %v2802_v45 = vpop.eup %2801  ;;  %v1375_v2 = vmul.f32 %v1311_v34, %v3960_v10  ;;  %v1377_v40 = vmul.f32 %v1313_v57, %v865_v44  ;;  %v4022_v30 = vmul.f32 %v1009_v61, %v3964_v41  ;;  %2809 = vtanh.f32 %v1186_v17 }
 0x20d   : > { %v821_v0 = vpop.f32.mrb[60].mxu0  ;;  %v2804_v32 = vpop.eup %2803  ;;  %v1310_v56 = vadd.f32 1.0, %v2802_v45  ;;  %v1012_v43 = vmul.f32 %v948_v9, %v3992_v35  ;;  %2811 = vtanh.f32 %v1188_v26  ;;  %v4026_v63 = vadd.f32 %v813_v28, %v3501_v59 }
 0x20e   : > { %v823_v52 = vpop.f32.mrb[61].mxu0  ;;  %v1455_v42 = vpack.c.bf16 %v1377_v40, %v1375_v2  ;;  %v1312_v23 = vadd.f32 1.0, %v2804_v32  ;;  %v4031_v10 = vmul.f32 %v1010_v21, %v3976_v7  ;;  %v949_v44 = vmul.f32 0.044715, %v4013_v20 }
 0x20f   : > { %v4028_v12 = vpop.f32.mrb[62].mxu0  ;;  %v4037_v34 = vmul.f32 %v1011_v15, %v3979_v6  ;;  %v866_v9 = vmul.f32 0.5, %v3778_v37  ;;  %v950_v62 = vmul.f32 0.044715, %v4018_v27  ;;  %v1127_v28 = vadd.f32 %v3891_v14, %v3830_v4 }
 0x210   : > { %v4034_v61 = vpop.f32.mrb[63].mxu0  ;;  %1694 = vmatprep.mubr.bf16.mxu1 %v1455_v42  ;;  %v1374_v57 = vmul.f32 %v1310_v56, %v862_v60  ;;  %v1376_v17 = vmul.f32 %v1312_v23, %v864_v3  ;;  %v868_v21 = vmul.f32 0.5, %v3790_v53  ;;  %v1129_v26 = vadd.f32 %v3919_v16, %v3864_v47 }
 0x211   : > { %v4047_v45 = vmul.f32 %v1012_v43, %v3992_v35  ;;  %v951_v15 = vmul.f32 0.044715, %v4026_v63  ;;  %v1191_v2 = vmul.f32 0.7978846, %v1127_v28  ;;  %v4051_v37 = vadd.f32 %v815_v1, %v3498_v58 }
 0x212   : > { %v2806_v40 = vpop.eup %2805  ;;  %v1454_v32 = vpack.c.bf16 %v1376_v17, %v1374_v57  ;;  %v1013_v14 = vmul.f32 %v949_v44, %v4013_v20  ;;  %v1193_v60 = vmul.f32 0.7978846, %v1129_v26  ;;  %v1126_v53 = vadd.f32 %v3888_v49, %v3824_v25 }
 0x213   : > { %v2808_v3 = vpop.eup %2807  ;;  %v1315_v56 = vadd.f32 1.0, %v2806_v40  ;;  %v1014_v16 = vmul.f32 %v950_v62, %v4018_v27  ;;  %2813 = vtanh.f32 %v1191_v2  ;;  %v1128_v43 = vadd.f32 %v3908_v24, %v3845_v31 }
 0x214   : > { %1695 = vmatmul.mubr.bf16.gmra.mrb[32].mxu1 %v1454_v32  ;;  %v1317_v42 = vadd.f32 1.0, %v2808_v3  ;;  %2815 = vtanh.f32 %v1193_v60  ;;  %v1190_v1 = vmul.f32 0.7978846, %v1126_v53  ;;  %v4061_v23 = vadd.f32 %v3996_v18, %v3501_v59 }
 0x215   : > { %v1015_v44 = vmul.f32 %v951_v15, %v4026_v63  ;;  %v952_v49 = vmul.f32 0.044715, %v4051_v37  ;;  %v1192_v28 = vmul.f32 0.7978846, %v1128_v43  ;;  %v4066_v57 = vadd.f32 %v821_v0, %v3498_v58 }
 0x216   : > { %v2810_v62 = vpop.eup %2809  ;;  %v1379_v17 = vmul.f32 %v1315_v56, %v4003_v8  ;;  %v1381_v24 = vmul.f32 %v1317_v42, %v869_v50  ;;  %v871_v26 = vmul.f32 0.5, %v3830_v4  ;;  %2817 = vtanh.f32 %v1190_v1 }
 0x217   : > { %v2812_v2 = vpop.eup %2811  ;;  %v1314_v40 = vadd.f32 1.0, %v2810_v62  ;;  %2819 = vtanh.f32 %v1192_v28  ;;  %v953_v18 = vmul.f32 0.044715, %v4061_v23  ;;  %v4072_v15 = vadd.f32 %v823_v52, %v3501_v59 }
 0x218   : > { %v1457_v32 = vpack.c.bf16 %v1381_v24, %v1379_v17  ;;  %v1316_v60 = vadd.f32 1.0, %v2812_v2  ;;  %v873_v0 = vmul.f32 0.5, %v3864_v47  ;;  %v954_v53 = vmul.f32 0.044715, %v4066_v57 }
 0x219   : > { %v4077_v8 = vmul.f32 %v1013_v14, %v4013_v20  ;;  %v4080_v4 = vmul.f32 %v1014_v16, %v4018_v27  ;;  %v4083_v50 = vmul.f32 %v1015_v44, %v4026_v63  ;;  %v1016_v3 = vmul.f32 %v952_v49, %v4051_v37 }
 0x21a   : > { %1702 = vmatprep.mubr.bf16.mxu1 %v1457_v32  ;;  %v1378_v52 = vmul.f32 %v1314_v40, %v866_v9  ;;  %v1380_v56 = vmul.f32 %v1316_v60, %v868_v21  ;;  %v870_v43 = vmul.f32 0.5, %v3824_v25  ;;  %v1131_v47 = vadd.f32 %v3935_v39, %v3873_v46 }
 0x21b   : > { %v872_v42 = vmul.f32 0.5, %v3845_v31  ;;  %v1017_v14 = vmul.f32 %v953_v18, %v4061_v23  ;;  %v955_v16 = vmul.f32 0.044715, %v4072_v15  ;;  %v1133_v1 = vadd.f32 %v3968_v33, %v3912_v48 }
 0x21c   : > { %v1456_v44 = vpack.c.bf16 %v1380_v56, %v1378_v52  ;;  %v1018_v49 = vmul.f32 %v954_v53, %v4066_v57  ;;  %v1195_v28 = vmul.f32 0.7978846, %v1131_v47  ;;  %v4097_v9 = vadd.f32 %v4028_v12, %v3498_v58 }
 0x21d   : > { %v2814_v25 = vpop.eup %2813  ;;  %v4100_v39 = vmul.f32 %v1016_v3, %v4051_v37  ;;  %v1197_v31 = vmul.f32 0.7978846, %v1133_v1  ;;  %v1130_v21 = vadd.f32 %v3927_v5, %v3868_v19  ;;  %v1132_v62 = vadd.f32 %v3957_v36, %v3901_v38 }
 0x21e   : > { %v2816_v33 = vpop.eup %2815  ;;  %1703 = vmatmul.mubr.bf16.gmra.mrb[36].mxu1 %v1456_v44  ;;  %v1319_v17 = vadd.f32 1.0, %v2814_v25  ;;  %v875_v24 = vmul.f32 0.5, %v3873_v46  ;;  %v877_v2 = vmul.f32 0.5, %v3912_v48  ;;  %2821 = vtanh.f32 %v1195_v28 }
 0x21f   : > { %v1321_v58 = vadd.f32 1.0, %v2816_v33  ;;  %v1019_v12 = vmul.f32 %v955_v16, %v4072_v15  ;;  %2823 = vtanh.f32 %v1197_v31  ;;  %v1194_v40 = vmul.f32 0.7978846, %v1130_v21 }
 0x220   : > { %v2818_v18 = vpop.eup %2817  ;;  %v1081_v32 = vmul.f32 %v1017_v14, %v4061_v23  ;;  %v4111_v5 = vmul.f32 %v1018_v49, %v4066_v57  ;;  %v956_v36 = vmul.f32 0.044715, %v4097_v9  ;;  %v1196_v60 = vmul.f32 0.7978846, %v1132_v62 }
 0x221   : > { %v2820_v53 = vpop.eup %2819  ;;  %v1383_v3 = vmul.f32 %v1319_v17, %v871_v26  ;;  %v1385_v46 = vmul.f32 %v1321_v58, %v873_v0  ;;  %v1318_v52 = vadd.f32 1.0, %v2818_v18  ;;  %2825 = vtanh.f32 %v1194_v40 }
 0x222   : > { %v1320_v48 = vadd.f32 1.0, %v2820_v53  ;;  %2827 = vtanh.f32 %v1196_v60  ;;  %v4116_v56 = vadd.f32 %v4034_v61, %v3501_v59  ;;  %v1135_v47 = vadd.f32 %v3982_v11, %v3924_v51 }
 0x223   : > { %v1459_v14 = vpack.c.bf16 %v1385_v46, %v1383_v3  ;;  %v4121_v16 = vmul.f32 %v1019_v12, %v4072_v15  ;;  %v874_v1 = vmul.f32 0.5, %v3868_v19  ;;  %v1137_v26 = vadd.f32 %v4022_v30, %v3964_v41 }
 0x224   : > { %v1382_v0 = vmul.f32 %v1318_v52, %v870_v43  ;;  %v1384_v44 = vmul.f32 %v1320_v48, %v872_v42  ;;  %v876_v49 = vmul.f32 0.5, %v3901_v38  ;;  %v1199_v28 = vmul.f32 0.7978846, %v1135_v47 }
 0x225   : > { %1710 = vmatprep.mubr.bf16.mxu1 %v1459_v14  ;;  %v1020_v59 = vmul.f32 %v956_v36, %v4097_v9  ;;  %v1201_v61 = vmul.f32 0.7978846, %v1137_v26  ;;  %v1134_v11 = vadd.f32 %v3972_v55, %v3915_v29  ;;  %v1136_v25 = vadd.f32 %v3999_v13, %v3945_v22 }
 0x226   : > { %v1458_v31 = vpack.c.bf16 %v1384_v44, %v1382_v0  ;;  %v957_v19 = vmul.f32 0.044715, %v4116_v56  ;;  %2829 = vtanh.f32 %v1199_v28  ;;  %v1139_v30 = vadd.f32 %v4037_v34, %v3979_v6 }
 0x227   : > { %2831 = vtanh.f32 %v1201_v61  ;;  %v1198_v38 = vmul.f32 0.7978846, %v1134_v11  ;;  %v1200_v43 = vmul.f32 0.7978846, %v1136_v25  ;;  %v1141_v42 = vadd.f32 %v4077_v8, %v4013_v20 }
 0x228   : > { %v2822_v21 = vpop.eup %2821  ;;  %1711 = vmatmul.mubr.bf16.gmra.mrb[40].mxu1 %v1458_v31  ;;  %v879_v55 = vmul.f32 0.5, %v3924_v51  ;;  %v881_v62 = vmul.f32 0.5, %v3964_v41  ;;  %v1203_v13 = vmul.f32 0.7978846, %v1139_v30  ;;  %v1138_v33 = vadd.f32 %v4031_v10, %v3976_v7 }
 0x229   : > { %v2824_v17 = vpop.eup %2823  ;;  %v1323_v58 = vadd.f32 1.0, %v2822_v21  ;;  %2833 = vtanh.f32 %v1198_v38  ;;  %v1205_v34 = vmul.f32 0.7978846, %v1141_v42  ;;  %v1140_v12 = vadd.f32 %v4047_v45, %v3992_v35 }
 0x22a   : > { %v1325_v40 = vadd.f32 1.0, %v2824_v17  ;;  %v1021_v8 = vmul.f32 %v957_v19, %v4116_v56  ;;  %2835 = vtanh.f32 %v1200_v43  ;;  %v1202_v18 = vmul.f32 0.7978846, %v1138_v33 }
 0x22b   : > { %v2826_v36 = vpop.eup %2825  ;;  %v1387_v51 = vmul.f32 %v1323_v58, %v875_v24  ;;  %v1084_v41 = vmul.f32 %v1020_v59, %v4097_v9  ;;  %2837 = vtanh.f32 %v1203_v13  ;;  %v1204_v60 = vmul.f32 0.7978846, %v1140_v12 }
 0x22c   : > { %v2828_v53 = vpop.eup %2827  ;;  %v1389_v10 = vmul.f32 %v1325_v40, %v877_v2  ;;  %v1322_v3 = vadd.f32 1.0, %v2826_v36  ;;  %2839 = vtanh.f32 %v1205_v34  ;;  %v1143_v46 = vadd.f32 %v4083_v50, %v4026_v63 }
 0x22d   : > { %v1324_v52 = vadd.f32 1.0, %v2828_v53  ;;  %v878_v45 = vmul.f32 0.5, %v3915_v29  ;;  %2841 = vtanh.f32 %v1202_v18  ;;  %v1145_v48 = vadd.f32 %v1081_v32, %v4061_v23 }
 0x22e   : > { %v1461_v47 = vpack.c.bf16 %v1389_v10, %v1387_v51  ;;  %v1085_v24 = vmul.f32 %v1021_v8, %v4116_v56  ;;  %2843 = vtanh.f32 %v1204_v60  ;;  %v1207_v14 = vmul.f32 0.7978846, %v1143_v46 }
 0x22f   : > { %v1386_v26 = vmul.f32 %v1322_v3, %v874_v1  ;;  %v1388_v0 = vmul.f32 %v1324_v52, %v876_v49  ;;  %v1209_v44 = vmul.f32 0.7978846, %v1145_v48  ;;  %v1142_v2 = vadd.f32 %v4080_v4, %v4018_v27 }
 0x230   : > { %v2830_v28 = vpop.eup %2829  ;;  %1718 = vmatprep.mubr.bf16.mxu1 %v1461_v47  ;;  %v880_v50 = vmul.f32 0.5, %v3945_v22  ;;  %v883_v29 = vmul.f32 0.5, %v3979_v6  ;;  %2845 = vtanh.f32 %v1207_v14  ;;  %v1144_v32 = vadd.f32 %v4100_v39, %v4051_v37 }
 0x231   : > { %v2832_v59 = vpop.eup %2831  ;;  %v1460_v61 = vpack.c.bf16 %v1388_v0, %v1386_v26  ;;  %v1327_v11 = vadd.f32 1.0, %v2830_v28  ;;  %2847 = vtanh.f32 %v1209_v44  ;;  %v1206_v1 = vmul.f32 0.7978846, %v1142_v2 }
 0x232   : > { %v1329_v49 = vadd.f32 1.0, %v2832_v59  ;;  %v1208_v25 = vmul.f32 0.7978846, %v1144_v32  ;;  %v1147_v4 = vadd.f32 %v4121_v16, %v4072_v15  ;;  %v1149_v31 = vadd.f32 %v1085_v24, %v4116_v56 }
 0x233   : > { %v2834_v19 = vpop.eup %2833  ;;  %1719 = vmatmul.mubr.bf16.gmra.mrb[44].mxu1 %v1460_v61  ;;  %v1391_v22 = vmul.f32 %v1327_v11, %v879_v55  ;;  %v885_v6 = vmul.f32 0.5, %v4013_v20  ;;  %v882_v30 = vmul.f32 0.5, %v3976_v7  ;;  %2849 = vtanh.f32 %v1206_v1 }
 0x234   : > { %v2836_v39 = vpop.eup %2835  ;;  %v1393_v38 = vmul.f32 %v1329_v49, %v881_v62  ;;  %v1326_v43 = vadd.f32 1.0, %v2834_v19  ;;  %2851 = vtanh.f32 %v1208_v25  ;;  %v1211_v42 = vmul.f32 0.7978846, %v1147_v4 }
 0x235   : > { %v2838_v21 = vpop.eup %2837  ;;  %v1328_v13 = vadd.f32 1.0, %v2836_v39  ;;  %v1213_v33 = vmul.f32 0.7978846, %v1149_v31  ;;  %v1146_v16 = vadd.f32 %v4111_v5, %v4066_v57  ;;  %v1148_v17 = vadd.f32 %v1084_v41, %v4097_v9 }
 0x236   : > { %v2840_v58 = vpop.eup %2839  ;;  %v1463_v55 = vpack.c.bf16 %v1393_v38, %v1391_v22  ;;  %v1390_v34 = vmul.f32 %v1326_v43, %v878_v45  ;;  %v1331_v20 = vadd.f32 1.0, %v2838_v21  ;;  %2853 = vtanh.f32 %v1211_v42 }
 0x237   : > { %v2842_v7 = vpop.eup %2841  ;;  %v1392_v12 = vmul.f32 %v1328_v13, %v880_v50  ;;  %v1333_v40 = vadd.f32 1.0, %v2840_v58  ;;  %2855 = vtanh.f32 %v1213_v33  ;;  %v1210_v62 = vmul.f32 0.7978846, %v1146_v16  ;;  %v1406_v13 = vld [vmem:[#allocation2] sm:$0xff]  ;;  %v1407_v58 = vld [vmem:[#allocation2 + $0x8] sm:$0xff] }
 0x238   : > { %v2844_v8 = vpop.eup %2843  ;;  %1726 = vmatprep.mubr.bf16.mxu1 %v1463_v55  ;;  %v1395_v18 = vmul.f32 %v1331_v20, %v883_v29  ;;  %v884_v36 = vmul.f32 0.5, %v3992_v35  ;;  %v1330_v51 = vadd.f32 1.0, %v2842_v7  ;;  %v1212_v60 = vmul.f32 0.7978846, %v1148_v17  ;;  %v1408_v7 = vld [vmem:[#allocation2 + $0x10] sm:$0xff] }
 0x239   : > { %v1462_v5 = vpack.c.bf16 %v1392_v12, %v1390_v34  ;;  %v1397_v53 = vmul.f32 %v1333_v40, %v885_v6  ;;  %v1332_v41 = vadd.f32 1.0, %v2844_v8  ;;  %2857 = vtanh.f32 %v1210_v62  ;;  %v1409_v8 = vld [vmem:[#allocation2 + $0x18] sm:$0xff] }
 0x23a   : > { %v2846_v10 = vpop.eup %2845  ;;  %2859 = vtanh.f32 %v1212_v60  ;;  %v1394_v52 = vmul.f32 %v1330_v51, %v882_v30  ;;  %v887_v47 = vmul.f32 0.5, %v4026_v63  ;;  %v889_v24 = vmul.f32 0.5, %v4061_v23 }
 0x23b   : > { %v2848_v3 = vpop.eup %2847  ;;  %1727 = vmatmul.mubr.bf16.gmra.mrb[48].mxu1 %v1462_v5  ;;  %v1465_v46 = vpack.c.bf16 %v1397_v53, %v1395_v18  ;;  %v1396_v45 = vmul.f32 %v1332_v41, %v884_v36  ;;  %v1335_v48 = vadd.f32 1.0, %v2846_v10  ;;  %v886_v50 = vmul.f32 0.5, %v4018_v27  ;;  %v1410_v53 = vld [vmem:[#allocation2 + $0x20] sm:$0xff] }
 0x23c   : > { %v1337_v14 = vadd.f32 1.0, %v2848_v3  ;;  %v888_v29 = vmul.f32 0.5, %v4051_v37  ;;  %v891_v23 = vmul.f32 0.5, %v4072_v15  ;;  %v893_v25 = vmul.f32 0.5, %v4116_v56 }
 0x23d   : > { %v2850_v35 = vpop.eup %2849  ;;  %1734 = vmatprep.mubr.bf16.mxu1 %v1465_v46  ;;  %v1464_v26 = vpack.c.bf16 %v1396_v45, %v1394_v52  ;;  %v1399_v44 = vmul.f32 %v1335_v48, %v887_v47  ;;  %v890_v30 = vmul.f32 0.5, %v4066_v57  ;;  %v892_v39 = vmul.f32 0.5, %v4097_v9  ;;  %v1411_v46 = vld [vmem:[#allocation2 + $0x28] sm:$0xff] }
 0x23e   : > { %v2852_v0 = vpop.eup %2851  ;;  %v1401_v2 = vmul.f32 %v1337_v14, %v889_v24  ;;  %v1334_v28 = vadd.f32 1.0, %v2850_v35  ;;  %v1412_v14 = vld [vmem:[#allocation2 + $0x30] sm:$0xff] }
 0x23f   : > { %v1336_v32 = vadd.f32 1.0, %v2852_v0 }
 0x240   : > { %v2854_v59 = vpop.eup %2853  ;;  %v1467_v61 = vpack.c.bf16 %v1401_v2, %v1399_v44  ;;  %v1398_v1 = vmul.f32 %v1334_v28, %v886_v50  ;;  %v1413_v44 = vld [vmem:[#allocation2 + $0x38] sm:$0xff] }
 0x241   : > { %v2856_v11 = vpop.eup %2855  ;;  %v1400_v63 = vmul.f32 %v1336_v32, %v888_v29  ;;  %v1339_v49 = vadd.f32 1.0, %v2854_v59  ;;  %v1414_v59 = vld [vmem:[#allocation2 + $0x40] sm:$0xff] }
 0x242   : > { %v1341_v4 = vadd.f32 1.0, %v2856_v11 }
 0x243   : > { %v2858_v31 = vpop.eup %2857  ;;  %1735 = vmatmul.mubr.bf16.gmra.mrb[52].mxu1 %v1464_v26  ;;  %v1466_v19 = vpack.c.bf16 %v1400_v63, %v1398_v1  ;;  %v1403_v27 = vmul.f32 %v1339_v49, %v891_v23  ;;  %v1415_v63 = vld [vmem:[#allocation2 + $0x48] sm:$0xff] }
 0x244   : > { %v2860_v22 = vpop.eup %2859  ;;  %1742 = vmatprep.mubr.bf16.mxu1 %v1467_v61  ;;  %v1405_v6 = vmul.f32 %v1341_v4, %v893_v25  ;;  %v1338_v37 = vadd.f32 1.0, %v2858_v31 }
 0x245   : > { %v1340_v38 = vadd.f32 1.0, %v2860_v22 }
 0x246   : > { %v1469_v43 = vpack.c.bf16 %v1405_v6, %v1403_v27  ;;  %v1402_v42 = vmul.f32 %v1338_v37, %v890_v30  ;;  %v1417_v37 = vld [vmem:[#allocation2 + $0x58] sm:$0xff] }
 0x247   : > { %v1404_v21 = vmul.f32 %v1340_v38, %v892_v39 }
 0x249   : > { %v1468_v15 = vpack.c.bf16 %v1404_v21, %v1402_v42  ;;  %v1418_v21 = vld [vmem:[#allocation2 + $0x60] sm:$0xff] }
 0x24b   : > { %1743 = vmatmul.mubr.bf16.gmra.mrb[56].mxu1 %v1466_v19  ;;  %v1416_v19 = vld [vmem:[#allocation2 + $0x50] sm:$0xff] }
 0x24c   : > { %1750 = vmatprep.mubr.bf16.mxu1 %v1469_v43 }
 0x253   : > { %1751 = vmatmul.mubr.bf16.gmra.mrb[60].mxu1 %v1468_v15 }
 0x28a   : > { %v2460_v56 = vpop.f32.mrb[0].mxu1 }
 0x28b   : > { %v2461_v33 = vpop.f32.mrb[1].mxu1 }
 0x28c   : > { %v2462_v16 = vadd.f32 %v2461_v33, %v2460_v56  ;;  %v2463_v17 = vpop.f32.mrb[2].mxu1  ;;  %v1419_v33 = vld [vmem:[#allocation2 + $0x68] sm:$0xff] }
 0x28d   : > { %v2464_v55 = vpop.f32.mrb[3].mxu1 }
 0x28e   : > { %v1759_v34 = vadd.f32 %v2462_v16, %v1406_v13  ;;  %v2465_v20 = vadd.f32 %v2464_v55, %v2463_v17 }
 0x290   : > { %1791 = vst [vmem:[#allocation2] sm:$0xff] %v1759_v34  ;;  %v1760_v57 = vadd.f32 %v2465_v20, %v1407_v58  ;;  %v1420_v20 = vld [vmem:[#allocation2 + $0x70] sm:$0xff] }
 0x292   : > { %1792 = vst [vmem:[#allocation2 + $0x8] sm:$0xff] %v1760_v57  ;;  %v2466_v9 = vpop.f32.mrb[4].mxu1 }
 0x293   : > { %v2467_v12 = vpop.f32.mrb[5].mxu1 }
 0x294   : > { %v2468_v40 = vadd.f32 %v2467_v12, %v2466_v9  ;;  %v2469_v62 = vpop.f32.mrb[6].mxu1  ;;  %v1421_v12 = vld [vmem:[#allocation2 + $0x78] sm:$0xff] }
 0x295   : > { %v2470_v18 = vpop.f32.mrb[7].mxu1 }
 0x296   : > { %v1761_v36 = vadd.f32 %v2468_v40, %v1408_v7  ;;  %v2471_v51 = vadd.f32 %v2470_v18, %v2469_v62 }
 0x298   : > { %1793 = vst [vmem:[#allocation2 + $0x10] sm:$0xff] %v1761_v36  ;;  %v1762_v60 = vadd.f32 %v2471_v51, %v1409_v8  ;;  %v1422_v51 = vld [vmem:[#allocation2 + $0x80] sm:$0xff] }
 0x29a   : > { %1794 = vst [vmem:[#allocation2 + $0x18] sm:$0xff] %v1762_v60 }
 0x2a1   : > { %v2472_v5 = vpop.f32.mrb[8].mxu1 }
 0x2a2   : > { %v2473_v41 = vpop.f32.mrb[9].mxu1 }
 0x2a3   : > { %v2474_v10 = vadd.f32 %v2473_v41, %v2472_v5  ;;  %v2475_v3 = vpop.f32.mrb[10].mxu1  ;;  %v1423_v41 = vld [vmem:[#allocation2 + $0x88] sm:$0xff] }
 0x2a4   : > { %v2476_v52 = vpop.f32.mrb[11].mxu1 }
 0x2a5   : > { %v1763_v45 = vadd.f32 %v2474_v10, %v1410_v53  ;;  %v2477_v48 = vadd.f32 %v2476_v52, %v2475_v3 }
 0x2a7   : > { %1795 = vst [vmem:[#allocation2 + $0x20] sm:$0xff] %v1763_v45  ;;  %v1764_v47 = vadd.f32 %v2477_v48, %v1411_v46  ;;  %v1424_v48 = vld [vmem:[#allocation2 + $0x90] sm:$0xff] }
 0x2a9   : > { %1796 = vst [vmem:[#allocation2 + $0x28] sm:$0xff] %v1764_v47 }
 0x2ad   : > { %v2478_v24 = vpop.f32.mrb[12].mxu1 }
 0x2ae   : > { %v2479_v35 = vpop.f32.mrb[13].mxu1 }
 0x2af   : > { %v2480_v26 = vadd.f32 %v2479_v35, %v2478_v24  ;;  %v2481_v0 = vpop.f32.mrb[14].mxu1  ;;  %v1425_v35 = vld [vmem:[#allocation2 + $0x98] sm:$0xff] }
 0x2b0   : > { %v2482_v2 = vpop.f32.mrb[15].mxu1 }
 0x2b1   : > { %v1765_v28 = vadd.f32 %v2480_v26, %v1412_v14  ;;  %v2483_v50 = vadd.f32 %v2482_v2, %v2481_v0 }
 0x2b3   : > { %1797 = vst [vmem:[#allocation2 + $0x30] sm:$0xff] %v1765_v28  ;;  %v1766_v29 = vadd.f32 %v2483_v50, %v1413_v44  ;;  %v1426_v50 = vld [vmem:[#allocation2 + $0xa0] sm:$0xff] }
 0x2b5   : > { %1798 = vst [vmem:[#allocation2 + $0x38] sm:$0xff] %v1766_v29 }
 0x2ba   : > { %v2484_v32 = vpop.f32.mrb[16].mxu1 }
 0x2bb   : > { %v2485_v61 = vpop.f32.mrb[17].mxu1 }
 0x2bc   : > { %v2486_v11 = vadd.f32 %v2485_v61, %v2484_v32  ;;  %v2487_v1 = vpop.f32.mrb[18].mxu1  ;;  %v1427_v61 = vld [vmem:[#allocation2 + $0xa8] sm:$0xff] }
 0x2bd   : > { %v2488_v49 = vpop.f32.mrb[19].mxu1 }
 0x2be   : > { %v1767_v23 = vadd.f32 %v2486_v11, %v1414_v59  ;;  %v2489_v25 = vadd.f32 %v2488_v49, %v2487_v1 }
 0x2c0   : > { %1799 = vst [vmem:[#allocation2 + $0x40] sm:$0xff] %v1767_v23  ;;  %v1768_v4 = vadd.f32 %v2489_v25, %v1415_v63  ;;  %v1428_v25 = vld [vmem:[#allocation2 + $0xb0] sm:$0xff] }
 0x2c2   : > { %1800 = vst [vmem:[#allocation2 + $0x48] sm:$0xff] %v1768_v4 }
 0x2c7   : > { %v2490_v31 = vpop.f32.mrb[20].mxu1 }
 0x2c8   : > { %v2491_v22 = vpop.f32.mrb[21].mxu1 }
 0x2c9   : > { %v2492_v27 = vadd.f32 %v2491_v22, %v2490_v31  ;;  %v2493_v6 = vpop.f32.mrb[22].mxu1  ;;  %v1429_v22 = vld [vmem:[#allocation2 + $0xb8] sm:$0xff] }
 0x2ca   : > { %v2494_v30 = vpop.f32.mrb[23].mxu1 }
 0x2cb   : > { %v1769_v39 = vadd.f32 %v2492_v27, %v1416_v19  ;;  %v2495_v38 = vadd.f32 %v2494_v30, %v2493_v6 }
 0x2cd   : > { %1801 = vst [vmem:[#allocation2 + $0x50] sm:$0xff] %v1769_v39  ;;  %v1770_v43 = vadd.f32 %v2495_v38, %v1417_v37  ;;  %v1430_v38 = vld [vmem:[#allocation2 + $0xc0] sm:$0xff] }
 0x2cf   : > { %1802 = vst [vmem:[#allocation2 + $0x58] sm:$0xff] %v1770_v43 }
 0x2d3   : > { %v2496_v42 = vpop.f32.mrb[24].mxu1 }
 0x2d4   : > { %v2497_v15 = vpop.f32.mrb[25].mxu1 }
 0x2d5   : > { %v2498_v56 = vadd.f32 %v2497_v15, %v2496_v42  ;;  %v2499_v13 = vpop.f32.mrb[26].mxu1  ;;  %v1431_v15 = vld [vmem:[#allocation2 + $0xc8] sm:$0xff] }
 0x2d6   : > { %v2500_v16 = vpop.f32.mrb[27].mxu1 }
 0x2d7   : > { %v1771_v17 = vadd.f32 %v2498_v56, %v1418_v21  ;;  %v2501_v58 = vadd.f32 %v2500_v16, %v2499_v13 }
 0x2d9   : > { %1803 = vst [vmem:[#allocation2 + $0x60] sm:$0xff] %v1771_v17  ;;  %v1772_v55 = vadd.f32 %v2501_v58, %v1419_v33  ;;  %v1432_v58 = vld [vmem:[#allocation2 + $0xd0] sm:$0xff] }
 0x2db   : > { %1804 = vst [vmem:[#allocation2 + $0x68] sm:$0xff] %v1772_v55 }
 0x2dd   : > { %v2502_v34 = vpop.f32.mrb[28].mxu1 }
 0x2de   : > { %v2503_v57 = vpop.f32.mrb[29].mxu1 }
 0x2df   : > { %v2504_v9 = vadd.f32 %v2503_v57, %v2502_v34  ;;  %v2505_v7 = vpop.f32.mrb[30].mxu1  ;;  %v1433_v57 = vld [vmem:[#allocation2 + $0xd8] sm:$0xff] }
 0x2e0   : > { %v2506_v40 = vpop.f32.mrb[31].mxu1 }
 0x2e1   : > { %v1773_v62 = vadd.f32 %v2504_v9, %v1420_v20  ;;  %v2507_v8 = vadd.f32 %v2506_v40, %v2505_v7 }
 0x2e3   : > { %1805 = vst [vmem:[#allocation2 + $0x70] sm:$0xff] %v1773_v62  ;;  %v1774_v18 = vadd.f32 %v2507_v8, %v1421_v12  ;;  %v1434_v8 = vld [vmem:[#allocation2 + $0xe0] sm:$0xff] }
 0x2e5   : > { %1806 = vst [vmem:[#allocation2 + $0x78] sm:$0xff] %v1774_v18 }
 0x2e7   : > { %v2508_v36 = vpop.f32.mrb[32].mxu1 }
 0x2e8   : > { %v2509_v60 = vpop.f32.mrb[33].mxu1 }
 0x2e9   : > { %v2510_v5 = vadd.f32 %v2509_v60, %v2508_v36  ;;  %v2511_v53 = vpop.f32.mrb[34].mxu1  ;;  %v1435_v60 = vld [vmem:[#allocation2 + $0xe8] sm:$0xff] }
 0x2ea   : > { %v2512_v10 = vpop.f32.mrb[35].mxu1 }
 0x2eb   : > { %v1775_v3 = vadd.f32 %v2510_v5, %v1422_v51  ;;  %v2513_v46 = vadd.f32 %v2512_v10, %v2511_v53 }
 0x2ed   : > { %1807 = vst [vmem:[#allocation2 + $0x80] sm:$0xff] %v1775_v3  ;;  %v1776_v52 = vadd.f32 %v2513_v46, %v1423_v41  ;;  %v1436_v46 = vld [vmem:[#allocation2 + $0xf0] sm:$0xff] }
 0x2ef   : > { %1808 = vst [vmem:[#allocation2 + $0x88] sm:$0xff] %v1776_v52 }
 0x2f1   : > { %v2514_v45 = vpop.f32.mrb[36].mxu1 }
 0x2f2   : > { %v2515_v47 = vpop.f32.mrb[37].mxu1 }
 0x2f3   : > { %v2516_v24 = vadd.f32 %v2515_v47, %v2514_v45  ;;  %v2517_v14 = vpop.f32.mrb[38].mxu1  ;;  %v1437_v47 = vld [vmem:[#allocation2 + $0xf8] sm:$0xff] }
 0x2f4   : > { %v2518_v26 = vpop.f32.mrb[39].mxu1 }
 0x2f5   : > { %v1777_v0 = vadd.f32 %v2516_v24, %v1424_v48  ;;  %v2519_v44 = vadd.f32 %v2518_v26, %v2517_v14 }
 0x2f7   : > { %1809 = vst [vmem:[#allocation2 + $0x90] sm:$0xff] %v1777_v0  ;;  %v1778_v2 = vadd.f32 %v2519_v44, %v1425_v35  ;;  %v1859_v0 = vld [vmem:[%s4346_s18] sm:$0x1] (!%p2275_p2) }
 0x2f8   : > { %v1827_v44 = vld [vmem:[#allocation2] sm:$0xff] (!%p2275_p2) }
 0x2f9   : > { %1810 = vst [vmem:[#allocation2 + $0x98] sm:$0xff] %v1778_v2  ;;  %v1828_v2 = vld [vmem:[#allocation2 + $0x8] sm:$0xff] (!%p2275_p2) }
 0x2fb   : > { %v2520_v28 = vpop.f32.mrb[40].mxu1 }
 0x2fc   : > { %v2521_v29 = vpop.f32.mrb[41].mxu1 }
 0x2fd   : > { %v2522_v32 = vadd.f32 %v2521_v29, %v2520_v28  ;;  %v2523_v59 = vpop.f32.mrb[42].mxu1  ;;  %v1860_v28 = vunpack.c.l.bf16 (!%p2275_p2), %v1859_v0  ;;  %v1830_v29 = vld [vmem:[#allocation2 + $0x18] sm:$0xff] (!%p2275_p2) }
 0x2fe   : > { %v2524_v11 = vpop.f32.mrb[43].mxu1 }
 0x2ff   : > { %v1779_v1 = vadd.f32 %v2522_v32, %v1426_v50  ;;  %v2525_v63 = vadd.f32 %v2524_v11, %v2523_v59  ;;  %v1829_v50 = vld [vmem:[#allocation2 + $0x10] sm:$0xff] (!%p2275_p2)  ;;  %v1831_v32 = vld [vmem:[#allocation2 + $0x20] sm:$0xff] (!%p2275_p2)  ;;  %v4178_v59 = vrot.slane (!%p2275_p2), %v1860_v28, %v3494_v54 }
 0x300   : > { %v1833_v11 = vld [vmem:[#allocation2 + $0x30] sm:$0xff] (!%p2275_p2) }
 0x301   : > { %1811 = vst [vmem:[#allocation2 + $0xa0] sm:$0xff] %v1779_v1  ;;  %v1780_v49 = vadd.f32 %v2525_v63, %v1427_v61  ;;  %v1832_v61 = vld [vmem:[#allocation2 + $0x28] sm:$0xff] (!%p2275_p2)  ;;  %v1834_v1 = vld [vmem:[#allocation2 + $0x38] sm:$0xff] (!%p2275_p2)  ;;  %v1835_v63 = vld [vmem:[#allocation2 + $0x40] sm:$0xff] (!%p2275_p2) }
 0x302   : > { %v1870_v54 = vadd.f32 (!%p2275_p2), %v4178_v59, %v1832_v61 }
 0x303   : > { %1812 = vst [vmem:[#allocation2 + $0xa8] sm:$0xff] %v1780_v49  ;;  %v1836_v49 = vld [vmem:[#allocation2 + $0x48] sm:$0xff] (!%p2275_p2) }
 0x306   : > { %v2526_v23 = vpop.f32.mrb[44].mxu1 }
 0x307   : > { %v2527_v4 = vpop.f32.mrb[45].mxu1 }
 0x308   : > { %v2528_v31 = vadd.f32 %v2527_v4, %v2526_v23  ;;  %v2529_v19 = vpop.f32.mrb[46].mxu1  ;;  %v1865_v23 = vadd.f32 (!%p2275_p2), %v4178_v59, %v1827_v44  ;;  %v1867_v4 = vadd.f32 (!%p2275_p2), %v4178_v59, %v1829_v50 }
 0x309   : > { %v2530_v27 = vpop.f32.mrb[47].mxu1 }
 0x30a   : > { %v1781_v6 = vadd.f32 %v2528_v31, %v1428_v25  ;;  %v2531_v37 = vadd.f32 %v2530_v27, %v2529_v19  ;;  %v1866_v25 = vadd.f32 (!%p2275_p2), %v4178_v59, %v1828_v2  ;;  %v1868_v31 = vadd.f32 (!%p2275_p2), %v4178_v59, %v1830_v29  ;;  %v1837_v19 = vld [vmem:[#allocation2 + $0x50] sm:$0xff] (!%p2275_p2) }
 0x30b   : > { %v1869_v27 = vadd.f32 (!%p2275_p2), %v4178_v59, %v1831_v32 }
 0x30c   : > { %1813 = vst [vmem:[#allocation2 + $0xb0] sm:$0xff] %v1781_v6  ;;  %v1782_v30 = vadd.f32 %v2531_v37, %v1429_v22  ;;  %v1838_v22 = vld [vmem:[#allocation2 + $0x58] sm:$0xff] (!%p2275_p2)  ;;  %v1871_v6 = vadd.f32 (!%p2275_p2), %v4178_v59, %v1833_v11  ;;  %v1872_v37 = vadd.f32 (!%p2275_p2), %v4178_v59, %v1834_v1 }
 0x30e   : > { %1814 = vst [vmem:[#allocation2 + $0xb8] sm:$0xff] %v1782_v30  ;;  %v2532_v39 = vpop.f32.mrb[48].mxu1  ;;  %v1839_v30 = vld [vmem:[#allocation2 + $0x60] sm:$0xff] (!%p2275_p2) }
 0x30f   : > { %v2533_v43 = vpop.f32.mrb[49].mxu1 }
 0x310   : > { %v2534_v42 = vadd.f32 %v2533_v43, %v2532_v39  ;;  %v2535_v21 = vpop.f32.mrb[50].mxu1  ;;  %v1840_v39 = vld [vmem:[#allocation2 + $0x68] sm:$0xff] (!%p2275_p2)  ;;  %v2352_v43 = vpack.c.bf16 (!%p2275_p2), %v1866_v25, %v1865_v23 }
 0x311   : > { %v2536_v56 = vpop.f32.mrb[51].mxu1 }
 0x312   : > { %v1783_v13 = vadd.f32 %v2534_v42, %v1430_v38  ;;  %v2537_v33 = vadd.f32 %v2536_v56, %v2535_v21  ;;  %v1841_v38 = vld [vmem:[#allocation2 + $0x70] sm:$0xff] (!%p2275_p2)  ;;  %v2357_v42 = vpack.c.bf16 (!%p2275_p2), %v1868_v31, %v1867_v4  ;;  %v1873_v21 = vadd.f32 (!%p2275_p2), %v4178_v59, %v1835_v63  ;;  %v1842_v56 = vld [vmem:[#allocation2 + $0x78] sm:$0xff] (!%p2275_p2)  ;;  %2353 = vst [vmem:[%s3422_s9] sm:$0xff] (!%p2275_p2), %v2352_v43  }
 0x314   : > { %1815 = vst [vmem:[#allocation2 + $0xc0] sm:$0xff] %v1783_v13  ;;  %v1784_v16 = vadd.f32 %v2537_v33, %v1431_v15  ;;  %v1874_v15 = vadd.f32 (!%p2275_p2), %v4178_v59, %v1836_v49  ;;  %v1843_v13 = vld [vmem:[#allocation2 + $0x80] sm:$0xff] (!%p2275_p2)  ;;  %v1844_v33 = vld [vmem:[#allocation2 + $0x88] sm:$0xff] (!%p2275_p2)  ;;  %2429 = vst [vmem:[%s3422_s9 + $0x8] sm:$0xff] (!%p2275_p2), %v2357_v42  }
 0x316   : > { %1816 = vst [vmem:[#allocation2 + $0xc8] sm:$0xff] %v1784_v16  ;;  %v2538_v17 = vpop.f32.mrb[52].mxu1  ;;  %v2362_v16 = vpack.c.bf16 (!%p2275_p2), %v1870_v54, %v1869_v27 }
 0x317   : > { %v2539_v55 = vpop.f32.mrb[53].mxu1 }
 0x318   : > { %v2540_v34 = vadd.f32 %v2539_v55, %v2538_v17  ;;  %v2541_v20 = vpop.f32.mrb[54].mxu1  ;;  %v2367_v17 = vpack.c.bf16 (!%p2275_p2), %v1872_v37, %v1871_v6  ;;  %v1876_v55 = vadd.f32 (!%p2275_p2), %v4178_v59, %v1838_v22  ;;  %2430 = vst [vmem:[%s3422_s9 + $0x10] sm:$0xff] (!%p2275_p2), %v2362_v16  }
 0x319   : > { %v2542_v9 = vpop.f32.mrb[55].mxu1 }
 0x31a   : > { %v1785_v7 = vadd.f32 %v2540_v34, %v1432_v58  ;;  %v2543_v12 = vadd.f32 %v2542_v9, %v2541_v20  ;;  %v1875_v58 = vadd.f32 (!%p2275_p2), %v4178_v59, %v1837_v19  ;;  %v1845_v34 = vld [vmem:[#allocation2 + $0x90] sm:$0xff] (!%p2275_p2)  ;;  %v1846_v20 = vld [vmem:[#allocation2 + $0x98] sm:$0xff] (!%p2275_p2)  ;;  %v2372_v9 = vpack.c.bf16 (!%p2275_p2), %v1874_v15, %v1873_v21  ;;  %2431 = vst [vmem:[%s3422_s9 + $0x18] sm:$0xff] (!%p2275_p2), %v2367_v17  }
 0x31c   : > { %1817 = vst [vmem:[#allocation2 + $0xd0] sm:$0xff] %v1785_v7  ;;  %v1786_v40 = vadd.f32 %v2543_v12, %v1433_v57  ;;  %v1847_v57 = vld [vmem:[#allocation2 + $0xa0] sm:$0xff] (!%p2275_p2)  ;;  %v1877_v7 = vadd.f32 (!%p2275_p2), %v4178_v59, %v1839_v30  ;;  %v1878_v12 = vadd.f32 (!%p2275_p2), %v4178_v59, %v1840_v39  ;;  %2432 = vst [vmem:[%s3422_s9 + $0x20] sm:$0xff] (!%p2275_p2), %v2372_v9  }
 0x31e   : > { %1818 = vst [vmem:[#allocation2 + $0xd8] sm:$0xff] %v1786_v40  ;;  %v2544_v62 = vpop.f32.mrb[56].mxu1  ;;  %v1879_v40 = vadd.f32 (!%p2275_p2), %v4178_v59, %v1841_v38 }
 0x31f   : > { %v2545_v18 = vpop.f32.mrb[57].mxu1 }
 0x320   : > { %v2546_v36 = vadd.f32 %v2545_v18, %v2544_v62  ;;  %v2547_v51 = vpop.f32.mrb[58].mxu1  ;;  %v1848_v62 = vld [vmem:[#allocation2 + $0xa8] sm:$0xff] (!%p2275_p2)  ;;  %v2377_v18 = vpack.c.bf16 (!%p2275_p2), %v1876_v55, %v1875_v58 }
 0x321   : > { %v2548_v5 = vpop.f32.mrb[59].mxu1 }
 0x322   : > { %v1787_v53 = vadd.f32 %v2546_v36, %v1434_v8  ;;  %v2549_v41 = vadd.f32 %v2548_v5, %v2547_v51  ;;  %v1849_v8 = vld [vmem:[#allocation2 + $0xb0] sm:$0xff] (!%p2275_p2)  ;;  %v1880_v36 = vadd.f32 (!%p2275_p2), %v4178_v59, %v1842_v56  ;;  %v1881_v51 = vadd.f32 (!%p2275_p2), %v4178_v59, %v1843_v13  ;;  %v1850_v5 = vld [vmem:[#allocation2 + $0xb8] sm:$0xff] (!%p2275_p2)  ;;  %2433 = vst [vmem:[%s3422_s9 + $0x28] sm:$0xff] (!%p2275_p2), %v2377_v18  }
 0x323   : > { %v1888_v28 = vadd.f32 (!%p2275_p2), %v4178_v59, %v1850_v5 }
 0x324   : > { %1819 = vst [vmem:[#allocation2 + $0xe0] sm:$0xff] %v1787_v53  ;;  %v1788_v10 = vadd.f32 %v2549_v41, %v1435_v60  ;;  %v1882_v60 = vadd.f32 (!%p2275_p2), %v4178_v59, %v1844_v33  ;;  %v1851_v53 = vld [vmem:[#allocation2 + $0xc0] sm:$0xff] (!%p2275_p2)  ;;  %v1852_v41 = vld [vmem:[#allocation2 + $0xc8] sm:$0xff] (!%p2275_p2) }
 0x325   : > { %v1889_v50 = vadd.f32 (!%p2275_p2), %v4178_v59, %v1851_v53  ;;  %v1890_v29 = vadd.f32 (!%p2275_p2), %v4178_v59, %v1852_v41 }
 0x326   : > { %1820 = vst [vmem:[#allocation2 + $0xe8] sm:$0xff] %v1788_v10  ;;  %v2550_v3 = vpop.f32.mrb[60].mxu1  ;;  %v2382_v10 = vpack.c.bf16 (!%p2275_p2), %v1878_v12, %v1877_v7 }
 0x327   : > { %v2551_v52 = vpop.f32.mrb[61].mxu1  ;;  %v2412_v23 = vpack.c.bf16 (!%p2275_p2), %v1890_v29, %v1889_v50 }
 0x328   : > { %v2552_v45 = vadd.f32 %v2551_v52, %v2550_v3  ;;  %v2553_v48 = vpop.f32.mrb[62].mxu1  ;;  %1826 = sbr.rel (%p2275_p2) target bundleno = 827 (0x33b), region = 60  ;;  %v1883_v3 = vadd.f32 (!%p2275_p2), %v4178_v59, %v1845_v34  ;;  %v1885_v52 = vadd.f32 (!%p2275_p2), %v4178_v59, %v1847_v57  ;;  %2434 = vst [vmem:[%s3422_s9 + $0x30] sm:$0xff] (!%p2275_p2), %v2382_v10  }
 0x329   : > { %v2554_v24 = vpop.f32.mrb[63].mxu1  ;;  %2440 = vst [vmem:[%s3422_s9 + $0x60] sm:$0xff] (!%p2275_p2), %v2412_v23  }
 0x32a   : > { %v1789_v14 = vadd.f32 %v2552_v45, %v1436_v46  ;;  %v2555_v35 = vadd.f32 %v2554_v24, %v2553_v48  ;;  %v1884_v46 = vadd.f32 (!%p2275_p2), %v4178_v59, %v1846_v20  ;;  %v1853_v45 = vld [vmem:[#allocation2 + $0xd0] sm:$0xff] (!%p2275_p2)  ;;  %v1854_v48 = vld [vmem:[#allocation2 + $0xd8] sm:$0xff] (!%p2275_p2)  ;;  %v2387_v24 = vpack.c.bf16 (!%p2275_p2), %v1880_v36, %v1879_v40 }
 0x32b   : > { %v1891_v11 = vadd.f32 (!%p2275_p2), %v4178_v59, %v1853_v45  ;;  %v1892_v1 = vadd.f32 (!%p2275_p2), %v4178_v59, %v1854_v48 }
 0x32c   : > { %1821 = vst [vmem:[#allocation2 + $0xf0] sm:$0xff] %v1789_v14  ;;  %v1790_v26 = vadd.f32 %v2555_v35, %v1437_v47  ;;  %v1855_v47 = vld [vmem:[#allocation2 + $0xe0] sm:$0xff] (!%p2275_p2)  ;;  %v2392_v14 = vpack.c.bf16 (!%p2275_p2), %v1882_v60, %v1881_v51  ;;  %v1886_v35 = vadd.f32 (!%p2275_p2), %v4178_v59, %v1848_v62  ;;  %v2397_v2 = vpack.c.bf16 (!%p2275_p2), %v1884_v46, %v1883_v3 }
 0x32d   : > { %v1856_v0 = vld [vmem:[#allocation2 + $0xe8] sm:$0xff] (!%p2275_p2)  ;;  %2435 = vst [vmem:[%s3422_s9 + $0x38] sm:$0xff] (!%p2275_p2), %v2387_v24   ;;  %v1893_v63 = vadd.f32 (!%p2275_p2), %v4178_v59, %v1855_v47  ;;  %v2417_v31 = vpack.c.bf16 (!%p2275_p2), %v1892_v1, %v1891_v11 }
 0x32e   : > { %1822 = vst [vmem:[#allocation2 + $0xf8] sm:$0xff] %v1790_v26  ;;  %v1887_v26 = vadd.f32 (!%p2275_p2), %v4178_v59, %v1849_v8  ;;  %2436 = vst [vmem:[%s3422_s9 + $0x40] sm:$0xff] (!%p2275_p2), %v2392_v14   ;;  %v2402_v61 = vpack.c.bf16 (!%p2275_p2), %v1886_v35, %v1885_v52  ;;  %v1894_v25 = vadd.f32 (!%p2275_p2), %v4178_v59, %v1856_v0 }
 0x32f   : > { %2437 = vst [vmem:[%s3422_s9 + $0x48] sm:$0xff] %v2397_v2   ;;  %2441 = vst [vmem:[%s3422_s9 + $0x68] sm:$0xff] %v2417_v31  }
 0x330   : > { %v2407_v49 = vpack.c.bf16 %v1888_v28, %v1887_v26  ;;  %2438 = vst [vmem:[%s3422_s9 + $0x50] sm:$0xff] %v2402_v61   ;;  %v2422_v22 = vpack.c.bf16 %v1894_v25, %v1893_v63 }
 0x332   : > { %2439 = vst [vmem:[%s3422_s9 + $0x58] sm:$0xff] %v2407_v49   ;;  %2442 = vst [vmem:[%s3422_s9 + $0x70] sm:$0xff] %v2422_v22  }
 0x333   : > { %v1857_v44 = vld [vmem:[#allocation2 + $0xf0] sm:$0xff] }
 0x334   : > { %v1895_v4 = vadd.f32 %v4178_v59, %v1857_v44 }
 0x335   : > { %v1858_v32 = vld [vmem:[#allocation2 + $0xf8] sm:$0xff] }
 0x336   : > { %v1896_v19 = vadd.f32 %v4178_v59, %v1858_v32 }
 0x338   : > { %v2427_v27 = vpack.c.bf16 %v1896_v19, %v1895_v4 }
 0x33a   : > { %2443 = vst [vmem:[%s3422_s9 + $0x78] sm:$0xff] %v2427_v27  }
 0x33b PF: > { %s4347_s24 = sld [smem:[#allocation15_spill]]  ;;  %s2071_s8 = sshll.u32 %s3422_s9, 4  ;;  %s4235_s8 = int_to_ptr.vmem [resolvable:$true] %s2071_s8 }
 0x33c   : > { %s4348_s7 = sld [smem:[#allocation23_spill]]  ;;  %s2058_s23 = scalar_lea.sflag [#allocation5], %s3395_s20 }
 0x33d   : > { %s2951_s4 = scalar_lea.vmem %s4235_s8, 2048  ;;  %p4349_p11 = scmp.ne.s32.totalorder %s4336_s14, 0 }
 0x33e   : > { %p2952_p13 = scmp.ne.s32.totalorder %s4235_s8, %s2951_s4  ;;  %s3089_s15 = smov [#allocation9]  }
 0x33f   : > { %s2955_s30 = sshll.u32 %s3089_s15, 4  ;;  %s2956_s30 = int_to_ptr.vmem [resolvable:$false] %s2955_s30 }
 0x340   : > { %p2953_p6 = pnand %p2952_p13, %p4349_p11  ;;  %s2957_s13 = scalar_lea.vmem %s2956_s30, 4096 }
 0x341   : > { %s2348_s27 = sshll.u32 %s4347_s24, 11  ;;  %p2958_p1 = scmp.lt.s32.totalorder %s4235_s8, %s2956_s30 }
 0x342   : > { %s4232_s6 = scalar_lea.hbm %s4348_s7, %s2348_s27  ;;  %p2954_p5 = pneg %p2953_p6 }
 0x343   : > { %p2959_p0 = scmp.lt.s32.totalorder %s2957_s13, %s2951_s4 }
 0x345   : > { %p2960_p9 = por %p2959_p0, %p2958_p1 }
 0x347   : > { %p2961_p12 = pnand %p2960_p9, %p2954_p5 }
 0x349   : > { %2964 = shalt.err (!%p2961_p12)
}
 0x34a   : > { %s2965_s12 = scalar_lea.hbm %s4232_s6, 2048  ;;  %s2969_s17 = scalar_lea.hbm %s4348_s7, 4096 }
 0x34b   : > { %p2966_p3 = scmp.ne.s32.totalorder %s4232_s6, %s2965_s12  ;;  %p2970_p8 = scmp.lt.u32.totalorder %s4232_s6, %s4348_s7 }
 0x34c   : > { %p2971_p10 = scmp.lt.u32.totalorder %s2969_s17, %s2965_s12  ;;  %p2973_p13 = scmp.lt.u32.totalorder %s2965_s12, %s4232_s6 }
 0x34d   : > { %p2967_p4 = pnand %p2966_p3, %p4349_p11 }
 0x34e   : > { %p2972_p2 = por %p2971_p10, %p2970_p8 }
 0x34f   : > { %p2968_p7 = pneg %p2967_p4 }
 0x350   : > { %p2974_p6 = por %p2973_p13, %p2972_p2 }
 0x352   : > { %p2975_p5 = pnand %p2974_p6, %p2968_p7 }
 0x354   : > { %2978 = shalt.err (!%p2975_p5)
}
 0x355   : > { %s3090_s16 = smov 64   ;;  %s3091_s18 = smov 4  }
 0x356   : > { %2562 = dma.vmem_to_hbm [thread:$0]  (%p4349_p11), %s4235_s8, 2048, %s4232_s6, %s2058_s23, %s3090_s16, %s3090_s16, %s3091_s18  }
 0x357 PF: > { %p2579_p1 = scmp.ge.s32.totalorder %s3077_s28, 2  ;;  %s2086_s24 = sand.u32 1, %s3049_s21  }
 0x358   : > { %p4350_p0 = scmp.ne.s32.totalorder %s4338_s5, 0  ;;  %s2087_s27 = scalar_lea.sflag [#allocation5], %s2086_s24 }
 0x35a   : > { %p2575_p9 = pnand %p2579_p1, %p4350_p0 }
 0x35c   : > { %3032 = dma.done.wait (!%p2575_p9), %s2087_s27, 2048  }
 0x35d   : > { %3034 = vsyncadd (!%p2575_p9), %s2087_s27, 4294965248  ;;  %s24_s28 = sadd.s32 1, %s3077_s28   ;;  %s4351_s11 = sld [smem:[#allocation13_spill]] }
 0x35e   : > { %p21_p12 = scmp.ge.s32.totalorder %s24_s28, 6   ;;  %s4352_s20 = sld [smem:[#allocation18_spill]] }
 0x35f   : > { %s4353_s14 = sld [smem:[#allocation14_spill]]  ;;  %s4354_s23 = sld [smem:[#allocation20_spill]] }
 0x360   : > { %s4355_s25 = sld [smem:[#allocation16_spill]]  ;;  %s4356_s29 = sld [smem:[#allocation17_spill]] }
 0x361   : > { %s4357_s27 = sld [smem:[#allocation19_spill]]  ;;  %s4358_s18 = smov %s3041_s19 }
 0x362   : > { %s4360_s21 = smov %s3053_s22  ;;  %s4362_s24 = smov %s3069_s26 }
 0x363   : > { %s4359_s19 = smov %s4351_s11  ;;  %23 = sbr.rel (!%p21_p12) target bundleno = 15 (0xf), region = 120 }
 0x365   : > { %s4361_s22 = smov %s4353_s14 }
 0x366   : > { %s4363_s26 = smov %s4356_s29 }
 0x36a   :  { %2092 = vsyncpa [#allocation4], 1 }
 0x36b   :  { %2094 = vsyncpa [#allocation4 + $0x1], 1 }
 0x36c   :  { %2095 = vsyncpa [#allocation7], 1 }
 0x36d   :  { %2097 = vsyncpa [#allocation7 + $0x1], 1 }
 0x36e   :  { %2098 = vsyncpa [#allocation5], 1 }
 0x36f   :  { %2100 = vsyncpa [#allocation5 + $0x1], 1 }

</bundles_post_ra>
